<compile_context>
chip_gen: v7x
topology: tpu7x:2x2x1
jax: 0.10.0
libtpu: 0.0.40
codegen_flags: <defaults>
</compile_context>

<pallas_src>
import numpy as np
import jax
import jax.numpy as jnp
from jax import lax
from jax.experimental import pallas as pl
from jax.experimental.pallas import tpu as pltpu

# ---------------- configuration (irreps_in = "8x0e + 4x1o", scalar_dim = 8) ---
S_MUL = 8                       # number of 0e scalars in irreps_in
V_MUL = 4                       # number of 1o vectors in irreps_in
SCALAR_DIM = 8                  # `scalar_dim` ctor arg (attention scalar slice)
D_IN = S_MUL + 3 * V_MUL        # 20
SH_DIM = 4                      # spherical harmonics lmax=1 -> "1x0e + 1x1o"
D_OUT = (S_MUL - V_MUL) + 3 * V_MUL   # gate output dim = 4 + 12 = 16
N_NODES = 16
N_EDGES = 64
BN_EPS = 1e-5
SQRT3 = float(np.sqrt(3.0))

# ---- node feature layout (wrapper-side pre-concat, padded to 32 lanes) -------
NODE_COLS = 32                  # [ h (0:20) | pos (20:23) | 1 (23) | zeros ]
C_ONE_IN = 23                   # constant-1 column (carries the attention bias)

# ---- composed node projection nf = node_feat @ M column layout ---------------
NF_COLS = 85                    # [ h rep4 (0:80) | pos (80:83) | proj_r+b (83) | proj_c (84) ]
C_POS = 80
C_PR = 83
C_PC = 84

# ---- packed parameter slab layout (all blocks start at 8-aligned rows) -------
R_M = 0             # [32, 85]  composed node projection (h rep4 | pos | attn projections)
R_TP = 32           # [80, 20]  stacked TP bilinear with o3.Linear folded in
R_EXP = 112         # [3, 80]   sh -> 80-lane block expansion
R_ONE = 120         # [1, 80]   ones in lanes 0:20 (sh0 == 1 block)
R_P = 128           # [12, 4]   xyz mean-pooling (BN vector norm)
R_Q = 144           # [4, 12]   per-vector -> per-component expansion (gate)
R_BNW = 152         # [1, 12]   BatchNorm weight
R_BNB = 160         # [1, 8]    BatchNorm bias (scalars only)
SLAB_ROWS = 168
SLAB_COLS = 128


def _second_moment(fn):
    # E_{z~N(0,1)}[fn(z)^2] via dense deterministic quadrature.
    # TODO(synk): e3nn's normalize2mom estimates this with 1e6 MC samples; we
    # use the exact quadrature value instead (differs in the ~3rd decimal).
    z = np.linspace(-10.0, 10.0, 400001)
    w = np.exp(-0.5 * z * z) / np.sqrt(2.0 * np.pi)
    f = fn(z) ** 2 * w
    return float(np.sum(0.5 * (f[1:] + f[:-1]) * np.diff(z)))


C_RELU = float(1.0 / np.sqrt(_second_moment(lambda z: np.maximum(z, 0.0))))      # = sqrt(2)
C_SIGMOID = float(1.0 / np.sqrt(_second_moment(lambda z: 1.0 / (1.0 + np.exp(-z)))))


# ------------------------------- Pallas kernel --------------------------------
def _equivariant_conv_kernel(nfeat_ref, eidx_ref, slab_ref, out_ref):
    f32 = jnp.float32

    node_feat = nfeat_ref[...]                  # [N, 32] = [h | pos | 1 | 0]
    h = node_feat[:, :D_IN]                     # [N, 20]
    N = nfeat_ref.shape[0]
    E2 = eidx_ref.shape[0]
    E = E2 // 2

    # --- unpack parameters from the single lane-dense slab (8-aligned rows) --
    M = slab_ref[R_M:R_M + NODE_COLS, 0:NF_COLS]               # [32, 85]
    Tfc = slab_ref[R_TP:R_TP + SH_DIM * D_IN, 0:D_IN]          # [80, 20]  (TP @ o3.Linear)
    Exp3 = slab_ref[R_EXP:R_EXP + 3, 0:4 * D_IN]               # [3, 80]
    ones_blk = slab_ref[R_ONE:R_ONE + 1, 0:4 * D_IN]           # [1, 80]
    P = slab_ref[R_P:R_P + 3 * V_MUL, 0:V_MUL]                 # [12, 4]
    Q = slab_ref[R_Q:R_Q + V_MUL, 0:3 * V_MUL]                 # [4, 12]
    bn_w = slab_ref[R_BNW:R_BNW + 1, 0:S_MUL + V_MUL]          # [1, 12]
    bn_b = slab_ref[R_BNB:R_BNB + 1, 0:S_MUL]                  # [1, 8]

    # --- node-level composed projection: one matmul, no lane concats ---------
    # nf = [ h replicated x4 | pos | h_s@awr + bias | h_s@awc ]
    nf = jnp.dot(node_feat, M, preferred_element_type=f32)     # [N, 85]

    # --- single fused gather for both edge endpoints (col first, then row) ---
    eidx = eidx_ref[...]                                       # [2E, 1] int32
    ids = lax.broadcasted_iota(jnp.int32, (E2, N), 1)
    G = ids == eidx                                            # bool [2E, N]
    G_f = G.astype(f32)                                        # one-hot (exact)
    pack = jnp.dot(G_f, nf, preferred_element_type=f32)        # [2E, 85]
    col_pack = pack[:E]                                        # gathered at col
    row_pack = pack[E:]                                        # gathered at row
    R_f = G_f[E:]                                              # [E, N] dest one-hot
    Rm = G[E:]                                                 # bool mask (softmax groups)

    h_rep = col_pack[:, :4 * D_IN]                             # h[col] replicated x4 [E, 80]
    edge_vec = row_pack[:, C_POS:C_POS + 3] - col_pack[:, C_POS:C_POS + 3]   # pos[row]-pos[col]
    logits = row_pack[:, C_PR:C_PR + 1] + col_pack[:, C_PC:C_PC + 1]         # bias already folded
    # attention MLP activation: LeakyReLU(0.2)
    logits = jnp.where(logits > 0.0, logits, 0.2 * logits)

    # spherical harmonics lmax=1, normalize=True, normalization='component'
    # (epsilon guards degenerate zero-length edges against NaN)
    inv_norm = lax.rsqrt(jnp.sum(edge_vec * edge_vec, axis=-1, keepdims=True) + 1e-12)
    sh1 = SQRT3 * edge_vec * inv_norm                          # [E, 3]; sh0 == 1

    # FullyConnectedTensorProduct(node_h[col], edge_sh) with o3.Linear folded in:
    #   feat[:, j*20+i] = h_col[i] * sh_ext[j],  msg_fc = feat @ (T_stacked @ L)
    # sh replication done on the MXU (Exp3) instead of lane concats.
    sh_rep = jnp.dot(sh1, Exp3, preferred_element_type=f32) + ones_blk       # [E, 80]
    msg = jnp.dot(h_rep * sh_rep, Tfc, preferred_element_type=f32)           # [E, 20]

    # torch_geometric segment softmax over edges grouped by `row`:
    # per-segment max for stability, normalization folded into the scatter.
    NEG = -1e30
    masked = jnp.where(Rm, logits, NEG)                        # [E, N]
    grp_max = jnp.max(masked, axis=0, keepdims=True)           # [1, N]
    max_e = jnp.sum(R_f * grp_max, axis=1, keepdims=True)      # [E, 1]
    u = jnp.exp(logits - max_e)                                # [E, 1]

    # scatter-add (index_add over row) of [msg*u | u] in one matmul
    X = jnp.concatenate([msg * u, u], axis=1)                  # [E, 21]
    agg_all = lax.dot_general(R_f, X, (((0,), (0,)), ((), ())),
                              preferred_element_type=f32)      # [N, 21]
    # torch_geometric softmax adds 1e-16 to the denominator; the per-node
    # division commutes with the linear scatter, so this is numerically faithful.
    agg = agg_all[:, :D_IN] / (agg_all[:, D_IN:D_IN + 1] + 1e-16)            # [N, 20]

    # o3.Linear already folded into Tfc; residual only
    h_new = agg + h

    # e3nn BatchNorm (training mode: batch statistics; affine; 'component' norm)
    # TODO(synk): running-mean/var buffer updates are stateful and not modeled.
    s = h_new[:, :S_MUL]                                       # [N, 8]
    v = h_new[:, S_MUL:]                                       # [N, 12]

    s_mean = jnp.mean(s, axis=0, keepdims=True)
    s_c = s - s_mean
    s_var = jnp.mean(s_c * s_c, axis=0, keepdims=True)
    s_bn = s_c * lax.rsqrt(s_var + BN_EPS) * bn_w[:, :S_MUL] + bn_b

    v_msq = jnp.mean(v * v, axis=0, keepdims=True)             # [1, 12]
    v_norm = jnp.dot(v_msq, P, preferred_element_type=f32)     # [1, 4] mean over xyz
    v_scale4 = lax.rsqrt(v_norm + BN_EPS) * bn_w[:, S_MUL:]    # [1, 4]

    # Gate: relu on first (S_MUL-V_MUL) scalars; sigmoid gates on next V_MUL
    # scalars multiply the vectors (ElementwiseTensorProduct == plain product).
    s_act = jnp.maximum(s_bn[:, :S_MUL - V_MUL], 0.0) * C_RELU               # [N, 4]
    z = s_bn[:, S_MUL - V_MUL:]                                              # [N, 4]
    gates4 = C_SIGMOID / (1.0 + jnp.exp(-z))                                 # [N, 4]
    g12 = jnp.dot(gates4 * v_scale4, Q, preferred_element_type=f32)          # [N, 12]
    v_out = v * g12                                                          # [N, 12]

    # direct stores (16-lane output is a masked vst either way; skip the concat)
    out_ref[:, :S_MUL - V_MUL] = s_act
    out_ref[:, S_MUL - V_MUL:] = v_out


# ------------------------------ parameter setup --------------------------------
def build_params(key):
    k_tp, k_ls, k_lv, k_aw, k_ab = jax.random.split(key, 5)

    # FullyConnectedTensorProduct("8x0e+4x1o", "1x0e+1x1o", "8x0e+4x1o"),
    # shared tp_weights of shape [1, weight_numel=144], instruction order:
    #   A:(0e,0e)->0e (8,1,8)  B:(0e,1o)->1o (8,1,4)  C:(1o,0e)->1o (4,1,4)  D:(1o,1o)->0e (4,1,8)
    tp_w = np.asarray(jax.random.normal(k_tp, (144,), jnp.float32))
    WA = tp_w[0:64].reshape(8, 8)
    WB = tp_w[64:96].reshape(8, 4)
    WC = tp_w[96:112].reshape(4, 4)
    WD = tp_w[112:144].reshape(4, 8)

    pw_s = np.sqrt(1.0 / 12.0)        # path weight into 0e outputs
    pw_v = 0.5                        # = sqrt(3/12), path weight into 1o outputs
    inv_sqrt3 = 1.0 / np.sqrt(3.0)    # wigner_3j(1,1,0)/(0,1,1)/(1,0,1) entries

    # dense bilinear tensor T[j, i, o]: msg[e,o] = sum_{j,i} sh[e,j] h_col[e,i] T[j,i,o]
    T = np.zeros((SH_DIM, D_IN, D_IN), np.float32)
    T[0, :S_MUL, :S_MUL] += pw_s * WA                               # path A
    for m in range(3):
        T[1 + m, :S_MUL, S_MUL + m::3] += pw_v * inv_sqrt3 * WB     # path B
        T[0, S_MUL + m::3, S_MUL + m::3] += pw_v * inv_sqrt3 * WC   # path C
        T[1 + m, S_MUL + m::3, :S_MUL] += pw_s * inv_sqrt3 * WD     # path D
    T_stacked = T.reshape(SH_DIM * D_IN, D_IN)                      # [80, 20]

    # o3.Linear("8x0e+4x1o" -> same): block matrix with 1/sqrt(fan_in) norm, no bias
    Ws = np.asarray(jax.random.normal(k_ls, (S_MUL, S_MUL), jnp.float32)) / np.sqrt(S_MUL)
    Wv = np.asarray(jax.random.normal(k_lv, (V_MUL, V_MUL), jnp.float32)) / np.sqrt(V_MUL)
    L = np.zeros((D_IN, D_IN), np.float32)
    L[:S_MUL, :S_MUL] = Ws
    for m in range(3):
        L[S_MUL + m::3, S_MUL + m::3] = Wv

    # fold o3.Linear into the TP bilinear (the per-edge attention scale and the
    # linear scatter commute with a right-multiplication on the feature axis)
    T_fc = (T_stacked @ L).astype(np.float32)                       # [80, 20]

    # attention_mlp: nn.Linear(2*scalar_dim, 1) (uniform +-1/sqrt(fan_in)) + bias
    bound = 1.0 / np.sqrt(2 * SCALAR_DIM)
    aw = np.asarray(jax.random.uniform(k_aw, (2 * SCALAR_DIM, 1), jnp.float32, -bound, bound))
    ab = float(np.asarray(jax.random.uniform(k_ab, (1, 1), jnp.float32, -bound, bound))[0, 0])

    # composed node projection M: [h|pos|1] -> [h rep4 | pos | proj_r(+bias) | proj_c]
    M = np.zeros((NODE_COLS, NF_COLS), np.float32)
    for b in range(4):
        M[np.arange(D_IN), b * D_IN + np.arange(D_IN)] = 1.0
    M[D_IN + np.arange(3), C_POS + np.arange(3)] = 1.0
    M[:SCALAR_DIM, C_PR] = aw[:SCALAR_DIM, 0]       # row-side attention projection
    M[C_ONE_IN, C_PR] = ab                          # attention bias rides the 1-column
    M[:SCALAR_DIM, C_PC] = aw[SCALAR_DIM:, 0]       # col-side attention projection

    # sh -> 80-lane block expansion (blocks 1..3), plus the constant sh0 block
    Exp3 = np.zeros((3, 4 * D_IN), np.float32)
    for m in range(3):
        Exp3[m, (m + 1) * D_IN:(m + 2) * D_IN] = 1.0
    ones_blk = np.zeros((1, 4 * D_IN), np.float32)
    ones_blk[0, :D_IN] = 1.0

    # xyz-component pooling / expansion matrices for the 1o blocks
    P = np.zeros((3 * V_MUL, V_MUL), np.float32)
    Q = np.zeros((V_MUL, 3 * V_MUL), np.float32)
    for u in range(V_MUL):
        P[3 * u:3 * u + 3, u] = 1.0 / 3.0
        Q[u, 3 * u:3 * u + 3] = 1.0

    # BatchNorm affine params (init weight=1, bias=0)
    bn_w = np.ones((S_MUL + V_MUL,), np.float32)
    bn_b = np.zeros((S_MUL,), np.float32)

    # pack everything into one lane-dense f32 slab (8-aligned row blocks) -> one DMA
    slab = np.zeros((SLAB_ROWS, SLAB_COLS), np.float32)
    slab[R_M:R_M + NODE_COLS, :NF_COLS] = M
    slab[R_TP:R_TP + SH_DIM * D_IN, :D_IN] = T_fc
    slab[R_EXP:R_EXP + 3, :4 * D_IN] = Exp3
    slab[R_ONE:R_ONE + 1, :4 * D_IN] = ones_blk
    slab[R_P:R_P + 3 * V_MUL, :V_MUL] = P
    slab[R_Q:R_Q + V_MUL, :3 * V_MUL] = Q
    slab[R_BNW, :S_MUL + V_MUL] = bn_w
    slab[R_BNB, :S_MUL] = bn_b
    return jnp.asarray(slab)


# --------------------------------- wrapper -------------------------------------
def equivariant_conv(node_h, pos, edge_index, param_slab):
    # TODO(synk): if this layer runs per-graph/per-layer, batch B graphs per
    # pallas_call with a leading grid axis (marked "parallel" for v7x's 2 TCs)
    # to amortize the fixed launch/DMA overhead; single-graph call kept here.
    N = node_h.shape[0]
    E = edge_index.shape[1]
    pad = jnp.zeros((N, NODE_COLS - D_IN - 3 - 1), jnp.float32)
    node_feat = jnp.concatenate(
        [node_h.astype(jnp.float32), pos.astype(jnp.float32),
         jnp.ones((N, 1), jnp.float32), pad], axis=1)                    # [N, 32]
    # flattened endpoints: col (source) first, then row (destination)
    eidx = jnp.concatenate([edge_index[1], edge_index[0]]).astype(jnp.int32)
    eidx = eidx.reshape(2 * E, 1)
    vmem = pl.BlockSpec(memory_space=pltpu.MemorySpace.VMEM)
    return pl.pallas_call(
        _equivariant_conv_kernel,
        out_shape=jax.ShapeDtypeStruct((N, D_OUT), jnp.float32),
        in_specs=[vmem, vmem, vmem],
        out_specs=vmem,
    )(node_feat, eidx, param_slab)


if __name__ == "__main__":
    key = jax.random.PRNGKey(0)
    k_h, k_p, k_r, k_c, k_params = jax.random.split(key, 5)

    node_h = jax.random.normal(k_h, (N_NODES, D_IN), jnp.float32)
    pos = jax.random.normal(k_p, (N_NODES, 3), jnp.float32)
    row = jax.random.randint(k_r, (N_EDGES,), 0, N_NODES, jnp.int32)
    off = jax.random.randint(k_c, (N_EDGES,), 1, N_NODES, jnp.int32)
    col = (row + off) % N_NODES          # guarantees row != col (nonzero edge_vec)
    edge_index = jnp.stack([row, col], axis=0)

    param_slab = build_params(k_params)
    out = equivariant_conv(node_h, pos, edge_index, param_slab)
    out = jax.block_until_ready(out)
    assert out.shape == (N_NODES, D_OUT), out.shape
    assert bool(jnp.all(jnp.isfinite(out)))
    print("KERNEL_OK")
</pallas_src>

<mosaic_0001>
module attributes {stable_mosaic.version = 11 : i64} {
  func.func @_equivariant_conv_kernel(%arg0: memref<16x32xf32, #tpu.memory_space<vmem>>, %arg1: memref<128x1xi32, #tpu.memory_space<vmem>>, %arg2: memref<168x128xf32, #tpu.memory_space<vmem>>, %arg3: memref<16x16xf32, #tpu.memory_space<vmem>>) attributes {dimension_semantics = [], scalar_prefetch = 0 : i64, scratch_operands = 0 : i64, tpu.core_type = #tpu.core_type<tc>} {
    %c0 = arith.constant 0 : index
    %c0_0 = arith.constant 0 : index
    %0 = vector.load %arg0[%c0, %c0_0] : memref<16x32xf32, #tpu.memory_space<vmem>>, vector<16x32xf32>
    %1 = vector.extract_strided_slice %0 {offsets = [0, 0], sizes = [16, 20], strides = [1, 1]} : vector<16x32xf32> to vector<16x20xf32>
    %c0_1 = arith.constant 0 : index
    %c0_2 = arith.constant 0 : index
    %2 = vector.load %arg2[%c0_1, %c0_2] : memref<168x128xf32, #tpu.memory_space<vmem>>, vector<32x85xf32>
    %c32 = arith.constant 32 : index
    %c0_3 = arith.constant 0 : index
    %3 = vector.load %arg2[%c32, %c0_3] : memref<168x128xf32, #tpu.memory_space<vmem>>, vector<80x20xf32>
    %c112 = arith.constant 112 : index
    %c0_4 = arith.constant 0 : index
    %4 = vector.load %arg2[%c112, %c0_4] : memref<168x128xf32, #tpu.memory_space<vmem>>, vector<3x80xf32>
    %c120 = arith.constant 120 : index
    %c0_5 = arith.constant 0 : index
    %5 = vector.load %arg2[%c120, %c0_5] : memref<168x128xf32, #tpu.memory_space<vmem>>, vector<1x80xf32>
    %c128 = arith.constant 128 : index
    %c0_6 = arith.constant 0 : index
    %6 = vector.load %arg2[%c128, %c0_6] : memref<168x128xf32, #tpu.memory_space<vmem>>, vector<12x4xf32>
    %c144 = arith.constant 144 : index
    %c0_7 = arith.constant 0 : index
    %7 = vector.load %arg2[%c144, %c0_7] : memref<168x128xf32, #tpu.memory_space<vmem>>, vector<4x12xf32>
    %c152 = arith.constant 152 : index
    %c0_8 = arith.constant 0 : index
    %8 = vector.load %arg2[%c152, %c0_8] : memref<168x128xf32, #tpu.memory_space<vmem>>, vector<1x12xf32>
    %c160 = arith.constant 160 : index
    %c0_9 = arith.constant 0 : index
    %9 = vector.load %arg2[%c160, %c0_9] : memref<168x128xf32, #tpu.memory_space<vmem>>, vector<1x8xf32>
    %cst = arith.constant dense<0.000000e+00> : vector<16x85xf32>
    %10 = tpu.matmul %0, %2, %cst {dimension_numbers = #tpu.dot_dimension_numbers<[1], [0], [0], [1], [0, 0, 1, 1], [], []>} : vector<16x32xf32>, vector<32x85xf32>, vector<16x85xf32> -> vector<16x85xf32>
    %c0_10 = arith.constant 0 : index
    %c0_11 = arith.constant 0 : index
    %11 = vector.load %arg1[%c0_10, %c0_11] : memref<128x1xi32, #tpu.memory_space<vmem>>, vector<128x1xi32>
    %12 = tpu.iota {dimensions = array<i32: 1>} : vector<128x16xi32>
    %13 = vector.broadcast %11 : vector<128x1xi32> to vector<128x16xi32>
    %14 = arith.cmpi eq, %12, %13 : vector<128x16xi32>
    %15 = arith.extui %14 : vector<128x16xi1> to vector<128x16xi32>
    %16 = arith.sitofp %15 : vector<128x16xi32> to vector<128x16xf32>
    %cst_12 = arith.constant dense<0.000000e+00> : vector<128x85xf32>
    %17 = tpu.matmul %16, %10, %cst_12 {dimension_numbers = #tpu.dot_dimension_numbers<[1], [0], [0], [1], [0, 0, 1, 1], [], []>} : vector<128x16xf32>, vector<16x85xf32>, vector<128x85xf32> -> vector<128x85xf32>
    %18 = vector.extract_strided_slice %17 {offsets = [0, 0], sizes = [64, 85], strides = [1, 1]} : vector<128x85xf32> to vector<64x85xf32>
    %19 = vector.extract_strided_slice %17 {offsets = [64, 0], sizes = [64, 85], strides = [1, 1]} : vector<128x85xf32> to vector<64x85xf32>
    %20 = vector.extract_strided_slice %16 {offsets = [64, 0], sizes = [64, 16], strides = [1, 1]} : vector<128x16xf32> to vector<64x16xf32>
    %21 = vector.extract_strided_slice %14 {offsets = [64, 0], sizes = [64, 16], strides = [1, 1]} : vector<128x16xi1> to vector<64x16xi1>
    %22 = vector.extract_strided_slice %18 {offsets = [0, 0], sizes = [64, 80], strides = [1, 1]} : vector<64x85xf32> to vector<64x80xf32>
    %23 = vector.extract_strided_slice %19 {offsets = [0, 80], sizes = [64, 3], strides = [1, 1]} : vector<64x85xf32> to vector<64x3xf32>
    %24 = vector.extract_strided_slice %18 {offsets = [0, 80], sizes = [64, 3], strides = [1, 1]} : vector<64x85xf32> to vector<64x3xf32>
    %25 = arith.subf %23, %24 : vector<64x3xf32>
    %26 = vector.extract_strided_slice %19 {offsets = [0, 83], sizes = [64, 1], strides = [1, 1]} : vector<64x85xf32> to vector<64x1xf32>
    %27 = vector.extract_strided_slice %18 {offsets = [0, 84], sizes = [64, 1], strides = [1, 1]} : vector<64x85xf32> to vector<64x1xf32>
    %28 = arith.addf %26, %27 : vector<64x1xf32>
    %cst_13 = arith.constant 0.000000e+00 : f32
    %29 = vector.broadcast %cst_13 : f32 to vector<64x1xf32>
    %30 = arith.cmpf ogt, %28, %29 : vector<64x1xf32>
    %cst_14 = arith.constant 2.000000e-01 : f32
    %31 = vector.broadcast %cst_14 : f32 to vector<64x1xf32>
    %32 = arith.mulf %31, %28 : vector<64x1xf32>
    %33 = arith.select %30, %28, %32 : vector<64x1xi1>, vector<64x1xf32>
    %34 = arith.mulf %25, %25 : vector<64x3xf32>
    %cst_15 = arith.constant dense<0.000000e+00> : vector<64xf32>
    %35 = vector.multi_reduction <add>, %34, %cst_15 [1] : vector<64x3xf32> to vector<64xf32>
    %36 = vector.shape_cast %35 : vector<64xf32> to vector<64x1xf32>
    %cst_16 = arith.constant 9.99999996E-13 : f32
    %37 = vector.broadcast %cst_16 : f32 to vector<64x1xf32>
    %38 = arith.addf %36, %37 : vector<64x1xf32>
    %39 = math.rsqrt %38 : vector<64x1xf32>
    %cst_17 = arith.constant 1.73205078 : f32
    %40 = vector.broadcast %cst_17 : f32 to vector<64x3xf32>
    %41 = arith.mulf %40, %25 : vector<64x3xf32>
    %42 = vector.broadcast %39 : vector<64x1xf32> to vector<64x3xf32>
    %43 = arith.mulf %41, %42 : vector<64x3xf32>
    %cst_18 = arith.constant dense<0.000000e+00> : vector<64x80xf32>
    %44 = tpu.matmul %43, %4, %cst_18 {dimension_numbers = #tpu.dot_dimension_numbers<[1], [0], [0], [1], [0, 0, 1, 1], [], []>} : vector<64x3xf32>, vector<3x80xf32>, vector<64x80xf32> -> vector<64x80xf32>
    %45 = vector.broadcast %5 : vector<1x80xf32> to vector<64x80xf32>
    %46 = arith.addf %44, %45 : vector<64x80xf32>
    %47 = arith.mulf %22, %46 : vector<64x80xf32>
    %cst_19 = arith.constant dense<0.000000e+00> : vector<64x20xf32>
    %48 = tpu.matmul %47, %3, %cst_19 {dimension_numbers = #tpu.dot_dimension_numbers<[1], [0], [0], [1], [0, 0, 1, 1], [], []>} : vector<64x80xf32>, vector<80x20xf32>, vector<64x20xf32> -> vector<64x20xf32>
    %cst_20 = arith.constant -1.000000e+30 : f32
    %49 = vector.shape_cast %33 : vector<64x1xf32> to vector<64x1xf32>
    %50 = vector.broadcast %49 : vector<64x1xf32> to vector<64x16xf32>
    %51 = vector.broadcast %cst_20 : f32 to vector<64x16xf32>
    %52 = arith.select %21, %50, %51 : vector<64x16xi1>, vector<64x16xf32>
    %cst_21 = arith.constant dense<0xFF800000> : vector<16xf32>
    %53 = vector.multi_reduction <maximumf>, %52, %cst_21 [0] : vector<64x16xf32> to vector<16xf32>
    %54 = vector.shape_cast %53 : vector<16xf32> to vector<1x16xf32>
    %55 = vector.broadcast %54 : vector<1x16xf32> to vector<64x16xf32>
    %56 = arith.mulf %20, %55 : vector<64x16xf32>
    %cst_22 = arith.constant dense<0.000000e+00> : vector<64xf32>
    %57 = vector.multi_reduction <add>, %56, %cst_22 [1] : vector<64x16xf32> to vector<64xf32>
    %58 = vector.shape_cast %57 : vector<64xf32> to vector<64x1xf32>
    %59 = arith.subf %33, %58 : vector<64x1xf32>
    %60 = math.exp %59 : vector<64x1xf32>
    %61 = vector.broadcast %60 : vector<64x1xf32> to vector<64x20xf32>
    %62 = arith.mulf %48, %61 : vector<64x20xf32>
    %63 = tpu.concatenate %62, %60 in 1 : vector<64x20xf32>, vector<64x1xf32> -> vector<64x21xf32>
    %cst_23 = arith.constant dense<0.000000e+00> : vector<16x21xf32>
    %64 = tpu.matmul %20, %63, %cst_23 {dimension_numbers = #tpu.dot_dimension_numbers<[0], [0], [1], [1], [0, 1, 1, 1], [], []>} : vector<64x16xf32>, vector<64x21xf32>, vector<16x21xf32> -> vector<16x21xf32>
    %65 = vector.extract_strided_slice %64 {offsets = [0, 0], sizes = [16, 20], strides = [1, 1]} : vector<16x21xf32> to vector<16x20xf32>
    %66 = vector.extract_strided_slice %64 {offsets = [0, 20], sizes = [16, 1], strides = [1, 1]} : vector<16x21xf32> to vector<16x1xf32>
    %cst_24 = arith.constant 1.000000e-16 : f32
    %67 = vector.broadcast %cst_24 : f32 to vector<16x1xf32>
    %68 = arith.addf %66, %67 : vector<16x1xf32>
    %69 = vector.broadcast %68 : vector<16x1xf32> to vector<16x20xf32>
    %70 = arith.divf %65, %69 : vector<16x20xf32>
    %71 = arith.addf %70, %1 : vector<16x20xf32>
    %72 = vector.extract_strided_slice %71 {offsets = [0, 0], sizes = [16, 8], strides = [1, 1]} : vector<16x20xf32> to vector<16x8xf32>
    %73 = vector.extract_strided_slice %71 {offsets = [0, 8], sizes = [16, 12], strides = [1, 1]} : vector<16x20xf32> to vector<16x12xf32>
    %cst_25 = arith.constant dense<0.000000e+00> : vector<8xf32>
    %74 = vector.multi_reduction <add>, %72, %cst_25 [0] : vector<16x8xf32> to vector<8xf32>
    %75 = vector.shape_cast %74 : vector<8xf32> to vector<1x8xf32>
    %cst_26 = arith.constant 1.600000e+01 : f32
    %76 = vector.broadcast %cst_26 : f32 to vector<1x8xf32>
    %77 = arith.divf %75, %76 : vector<1x8xf32>
    %78 = vector.broadcast %77 : vector<1x8xf32> to vector<16x8xf32>
    %79 = arith.subf %72, %78 : vector<16x8xf32>
    %80 = arith.mulf %79, %79 : vector<16x8xf32>
    %cst_27 = arith.constant dense<0.000000e+00> : vector<8xf32>
    %81 = vector.multi_reduction <add>, %80, %cst_27 [0] : vector<16x8xf32> to vector<8xf32>
    %82 = vector.shape_cast %81 : vector<8xf32> to vector<1x8xf32>
    %cst_28 = arith.constant 1.600000e+01 : f32
    %83 = vector.broadcast %cst_28 : f32 to vector<1x8xf32>
    %84 = arith.divf %82, %83 : vector<1x8xf32>
    %cst_29 = arith.constant 9.99999974E-6 : f32
    %85 = vector.broadcast %cst_29 : f32 to vector<1x8xf32>
    %86 = arith.addf %84, %85 : vector<1x8xf32>
    %87 = math.rsqrt %86 : vector<1x8xf32>
    %88 = vector.broadcast %87 : vector<1x8xf32> to vector<16x8xf32>
    %89 = arith.mulf %79, %88 : vector<16x8xf32>
    %90 = vector.extract_strided_slice %8 {offsets = [0, 0], sizes = [1, 8], strides = [1, 1]} : vector<1x12xf32> to vector<1x8xf32>
    %91 = vector.broadcast %90 : vector<1x8xf32> to vector<16x8xf32>
    %92 = arith.mulf %89, %91 : vector<16x8xf32>
    %93 = vector.broadcast %9 : vector<1x8xf32> to vector<16x8xf32>
    %94 = arith.addf %92, %93 : vector<16x8xf32>
    %95 = arith.mulf %73, %73 : vector<16x12xf32>
    %cst_30 = arith.constant dense<0.000000e+00> : vector<12xf32>
    %96 = vector.multi_reduction <add>, %95, %cst_30 [0] : vector<16x12xf32> to vector<12xf32>
    %97 = vector.shape_cast %96 : vector<12xf32> to vector<1x12xf32>
    %cst_31 = arith.constant 1.600000e+01 : f32
    %98 = vector.broadcast %cst_31 : f32 to vector<1x12xf32>
    %99 = arith.divf %97, %98 : vector<1x12xf32>
    %cst_32 = arith.constant dense<0.000000e+00> : vector<1x4xf32>
    %100 = tpu.matmul %99, %6, %cst_32 {dimension_numbers = #tpu.dot_dimension_numbers<[1], [0], [0], [1], [0, 0, 1, 1], [], []>} : vector<1x12xf32>, vector<12x4xf32>, vector<1x4xf32> -> vector<1x4xf32>
    %cst_33 = arith.constant 9.99999974E-6 : f32
    %101 = vector.broadcast %cst_33 : f32 to vector<1x4xf32>
    %102 = arith.addf %100, %101 : vector<1x4xf32>
    %103 = math.rsqrt %102 : vector<1x4xf32>
    %104 = vector.extract_strided_slice %8 {offsets = [0, 8], sizes = [1, 4], strides = [1, 1]} : vector<1x12xf32> to vector<1x4xf32>
    %105 = arith.mulf %103, %104 : vector<1x4xf32>
    %106 = vector.extract_strided_slice %94 {offsets = [0, 0], sizes = [16, 4], strides = [1, 1]} : vector<16x8xf32> to vector<16x4xf32>
    %cst_34 = arith.constant 0.000000e+00 : f32
    %107 = vector.broadcast %cst_34 : f32 to vector<16x4xf32>
    %108 = arith.maximumf %106, %107 : vector<16x4xf32>
    %cst_35 = arith.constant 1.41421354 : f32
    %109 = vector.broadcast %cst_35 : f32 to vector<16x4xf32>
    %110 = arith.mulf %108, %109 : vector<16x4xf32>
    %111 = vector.extract_strided_slice %94 {offsets = [0, 4], sizes = [16, 4], strides = [1, 1]} : vector<16x8xf32> to vector<16x4xf32>
    %cst_36 = arith.constant 0.000000e+00 : f32
    %112 = vector.broadcast %cst_36 : f32 to vector<16x4xf32>
    %113 = arith.subf %112, %111 : vector<16x4xf32>
    %114 = math.exp %113 : vector<16x4xf32>
    %cst_37 = arith.constant 1.000000e+00 : f32
    %115 = vector.broadcast %cst_37 : f32 to vector<16x4xf32>
    %116 = arith.addf %115, %114 : vector<16x4xf32>
    %cst_38 = arith.constant 1.8462286 : f32
    %117 = vector.broadcast %cst_38 : f32 to vector<16x4xf32>
    %118 = arith.divf %117, %116 : vector<16x4xf32>
    %119 = vector.broadcast %105 : vector<1x4xf32> to vector<16x4xf32>
    %120 = arith.mulf %118, %119 : vector<16x4xf32>
    %cst_39 = arith.constant dense<0.000000e+00> : vector<16x12xf32>
    %121 = tpu.matmul %120, %7, %cst_39 {dimension_numbers = #tpu.dot_dimension_numbers<[1], [0], [0], [1], [0, 0, 1, 1], [], []>} : vector<16x4xf32>, vector<4x12xf32>, vector<16x12xf32> -> vector<16x12xf32>
    %122 = arith.mulf %73, %121 : vector<16x12xf32>
    %c0_40 = arith.constant 0 : index
    %c0_41 = arith.constant 0 : index
    %123 = vector.load %arg3[%c0_40, %c0_41] : memref<16x16xf32, #tpu.memory_space<vmem>>, vector<16x4xf32>
    tpu.vector_store %arg3[%c0_40, %c0_41], %110 {strides = array<i32>} : memref<16x16xf32, #tpu.memory_space<vmem>>, vector<16x4xf32>,
    %c0_42 = arith.constant 0 : index
    %c4 = arith.constant 4 : index
    %124 = vector.load %arg3[%c0_42, %c4] : memref<16x16xf32, #tpu.memory_space<vmem>>, vector<16x12xf32>
    tpu.vector_store %arg3[%c0_42, %c4], %122 {strides = array<i32>} : memref<16x16xf32, #tpu.memory_space<vmem>>, vector<16x12xf32>,
    return
  }
}

</mosaic_0001>

<bundles_post_ra>
// kernel: tpu_custom_call.1
= control target key start
LH: loop header
LB: loop body
LE: loop exit
PB: predicated region body
PF: predicated region fallthrough
CT: control target
= control target key end

     0   :  { %8 = vsyncpa [#allocation3], 0  ;;  %s2500_s0 = inlined_call_operand.vmem [shape: f32[16,32], index: 0, kind: input, shape index: {}]   ;;  %s2501_s1 = inlined_call_operand.vmem [shape: s32[128,1], index: 1, kind: input, shape index: {}]   ;;  %s2502_s2 = inlined_call_operand.hbm [shape: f32[168,128], index: 2, kind: input, shape index: {}]   ;;  %s2503_s3 = inlined_call_operand.hbm [shape: f32[16,16], index: 3, kind: output, shape index: {}]  }
   0x1   :  { %9 = vsyncpa [#allocation4], 0  ;;  %s1971_s12 = smov [#allocation2]   ;;  %s1923_s16 = scalar_lea.hbm %s2502_s2, 2688 }
   0x2   :  { %s19_s13 = sshll.u32 %s1971_s12, 4  ;;  %p1924_p0 = scmp.ne.s32.totalorder %s2502_s2, %s1923_s16  ;;  %s20_s13 = int_to_ptr.vmem [resolvable:$true] %s19_s13 }
   0x3   :  { %p1927_p1 = scmp.lt.u32.totalorder %s1923_s16, %s2502_s2 }
   0x5   :  { %p1929_p2 = pnand %p1927_p1, %p1924_p0 }
   0x7   :  { %1932 = shalt.err (!%p1929_p2)
}
   0x8   :  { %s1933_s21 = scalar_lea.vmem %s20_s13, 2688  ;;  %p1938_p4 = scmp.lt.s32.totalorder %s20_s13, %s20_s13 }
   0x9   :  { %p1934_p3 = scmp.ne.s32.totalorder %s20_s13, %s1933_s21  ;;  %p1939_p5 = scmp.lt.s32.totalorder %s1933_s21, %s1933_s21 }
   0xb   :  { %p1940_p6 = por %p1939_p5, %p1938_p4 }
   0xd   :  { %p1941_p7 = pnand %p1940_p6, %p1934_p3 }
   0xf   :  { %1944 = shalt.err (!%p1941_p7)
}
  0x10   :  { %s1972_s22 = smov 128   ;;  %s1973_s23 = smov 8  }
  0x11   :  { %25 = dma.hbm_to_vmem [thread:$0]  %s2502_s2, 2688, %s20_s13, [#allocation3], %s1972_s22, %s1972_s22, %s1973_s23  }
  0x12   :  { %1967 = dma.done.wait [#allocation3], 2688  }
  0x13   :  { %1968 = vsyncadd [#allocation3], 4294964608  ;;  %v1974_v0 = vmov 0   ;;  %vm52_vm0 = vcmask 261120   ;;  %v31_v1 = vld [vmem:[#allocation2] sm:$0xff]  ;;  %v32_v2 = vld [vmem:[#allocation2 + $0x8] sm:$0xff]  ;;  %v150_v25 = vlaneseq }
  0x14   :  { %1848 = vset.pattern.permute.xlu0 %v1974_v0  ;;  %1849 = vset.pattern.permute.xlu1 %v1974_v0  ;;  %v33_v3 = vld [vmem:[#allocation2 + $0x10] sm:$0xff]  ;;  %v1779_v4 = vpack.c.bf16 %v32_v2, %v31_v1  ;;  %v34_v5 = vld [vmem:[#allocation2 + $0x18] sm:$0xff]  ;;  %v29_v6 = vld [vmem:[%s2500_s0] sm:$0xff]  ;;  %vm248_vm1 = vcmask 130048   ;;  %v1975_v28 = vmov 0.0   ;;  %s1978_s8 = smov 127  }
  0x15   :  { %v1783_v7 = vpack.c.bf16 %v34_v5, %v33_v3  ;;  %1671 = vmatprep.mubr.msk.f32.mxu0 %vm52_vm0, %v29_v6  ;;  %v134_v8 = vld [vmem:[%s2501_s1] sm:$0xff]  ;;  %v136_v9 = vld [vmem:[%s2501_s1 + $0x10] sm:$0xff]  ;;  %v135_v10 = vld [vmem:[%s2501_s1 + $0x8] sm:$0xff]  ;;  %v2080_v26 = vand.u32 127, %v150_v25  ;;  %s1979_s9 = smov 65   ;;  %s1985_s14 = smov 4  }
  0x16   :  { %1780 = vmatprep.subr.bf16.mxu0 %v1779_v4  ;;  %153 = vperm.xlu0 %1848, %v134_v8   ;;  %v137_v11 = vld [vmem:[%s2501_s1 + $0x18] sm:$0xff]  ;;  %v30_v12 = vld [vmem:[%s2500_s0 + $0x8] sm:$0xff]  ;;  %v138_v13 = vld [vmem:[%s2501_s1 + $0x20] sm:$0xff]  ;;  %s1986_s15 = smov 124   ;;  %s1987_s16 = smov [#allocation5]  }
  0x17   :  { %1782 = vmatpush3.bf16.msra.mxu0 %v1779_v4  ;;  %159 = vperm.xlu1 %1849, %v136_v9   ;;  %v139_v14 = vld [vmem:[%s2501_s1 + $0x28] sm:$0xff]  ;;  %v140_v15 = vld [vmem:[%s2501_s1 + $0x30] sm:$0xff]  ;;  %v141_v16 = vld [vmem:[%s2501_s1 + $0x38] sm:$0xff]  ;;  %s1524_s17 = sshll.u32 %s1987_s16, 4  ;;  %s1525_s17 = int_to_ptr.vmem [resolvable:$true] %s1524_s17 }
  0x18   :  { %1784 = vmatprep.subr.bf16.mxu0 %v1783_v7  ;;  %v142_v17 = vld [vmem:[%s2501_s1 + $0x40] sm:$0xff]  ;;  %v143_v18 = vld [vmem:[%s2501_s1 + $0x48] sm:$0xff]  ;;  %v144_v19 = vld [vmem:[%s2501_s1 + $0x50] sm:$0xff]  ;;  %s1945_s18 = scalar_lea.vmem %s1525_s17, 256  ;;  %p1950_p9 = scmp.lt.s32.totalorder %s1525_s17, %s1525_s17 }
  0x19   :  { %v145_v20 = vld [vmem:[%s2501_s1 + $0x58] sm:$0xff]  ;;  %v146_v21 = vld [vmem:[%s2501_s1 + $0x60] sm:$0xff]  ;;  %v147_v22 = vld [vmem:[%s2501_s1 + $0x68] sm:$0xff]  ;;  %p1946_p8 = scmp.ne.s32.totalorder %s1525_s17, %s1945_s18  ;;  %p1951_p10 = scmp.lt.s32.totalorder %s1945_s18, %s1945_s18 }
  0x1a   :  { %156 = vperm.xlu0 %1848, %v135_v10   ;;  %v148_v23 = vld [vmem:[%s2501_s1 + $0x70] sm:$0xff]  ;;  %v149_v24 = vld [vmem:[%s2501_s1 + $0x78] sm:$0xff]  ;;  %s1976_s1 = smov 48  }
  0x1b   :  { %1786 = vmatpush3.bf16.msra.mxu0 %v1783_v7  ;;  %162 = vperm.xlu1 %1849, %v137_v11   ;;  %p1952_p11 = por %p1951_p10, %p1950_p9 }
  0x1d   :  { %p1953_p12 = pnand %p1952_p11, %p1946_p8 }
  0x1e   :  { %1672 = vmatmul.mubr.msk.f32.vlgmr.msra.gmra.mrb[0].mxu0 %vm52_vm0, %v30_v12  ;;  %165 = vperm.xlu0 %1848, %v138_v13  }
  0x1f   :  { %168 = vperm.xlu1 %1849, %v139_v14  }
  0x22   :  { %171 = vperm.xlu0 %1848, %v140_v15  }
  0x23   :  { %174 = vperm.xlu1 %1849, %v141_v16  }
  0x26   :  { %177 = vperm.xlu0 %1848, %v142_v17  }
  0x27   :  { %180 = vperm.xlu1 %1849, %v143_v18  }
  0x2a   :  { %183 = vperm.xlu0 %1848, %v144_v19  }
  0x2b   :  { %186 = vperm.xlu1 %1849, %v145_v20  }
  0x2e   :  { %189 = vperm.xlu0 %1848, %v146_v21  }
  0x2f   :  { %192 = vperm.xlu1 %1849, %v147_v22  }
  0x32   :  { %195 = vperm.xlu0 %1848, %v148_v23  }
  0x33   :  { %198 = vperm.xlu1 %1849, %v149_v24  }
  0x95   :  { %v154_v27 = vpop.permute.xlu0 %153 }
  0x96   :  { %vm200_vm2 = vcmp.eq.s32.totalorder %v2080_v26, %v154_v27  ;;  %v160_v30 = vpop.permute.xlu1 %159 }
  0x97   :  { %v1538_v29 = vsel %vm200_vm2, 1.0, %v1975_v28  ;;  %vm202_vm3 = vcmp.eq.s32.totalorder %v2080_v26, %v160_v30 }
  0x98   :  { %1678 = vmatprep.mubr.msk.f32.mxu1 %vm248_vm1, %v1538_v29  ;;  %v1540_v40 = vsel %vm202_vm3, 1.0, %v1975_v28  ;;  %vm554_vm3 = vcmask 23552  }
  0x99   :  { %v157_v31 = vpop.permute.xlu0 %156 }
  0x9a   :  { %v163_v32 = vpop.permute.xlu1 %162  ;;  %vm201_vm4 = vcmp.eq.s32.totalorder %v2080_v26, %v157_v31 }
  0x9b   :  { %v1539_v41 = vsel %vm201_vm4, 1.0, %v1975_v28  ;;  %vm203_vm5 = vcmp.eq.s32.totalorder %v2080_v26, %v163_v32  ;;  %vm655_vm4 = vcmask 1042432  }
  0x9c   :  { %v1541_v43 = vsel %vm203_vm5, 1.0, %v1975_v28 }
  0x9d   :  { %v166_v33 = vpop.permute.xlu0 %165 }
  0x9e   :  { %v169_v34 = vpop.permute.xlu1 %168  ;;  %vm204_vm6 = vcmp.eq.s32.totalorder %v2080_v26, %v166_v33 }
  0x9f   :  { %v1542_v45 = vsel %vm204_vm6, 1.0, %v1975_v28  ;;  %vm205_vm7 = vcmp.eq.s32.totalorder %v2080_v26, %v169_v34 }
  0xa0   :  { %v1543_v47 = vsel %vm205_vm7, 1.0, %v1975_v28 }
  0xa1   :  { %v172_v37 = vpop.permute.xlu0 %171 }
  0xa2   :  { %v175_v39 = vpop.permute.xlu1 %174  ;;  %vm206_vm8 = vcmp.eq.s32.totalorder %v2080_v26, %v172_v37 }
  0xa3   :  { %v1544_v48 = vsel %vm206_vm8, 1.0, %v1975_v28  ;;  %vm207_vm9 = vcmp.eq.s32.totalorder %v2080_v26, %v175_v39 }
  0xa4   :  { %v1545_v50 = vsel %vm207_vm9, 1.0, %v1975_v28 }
  0xa5   :  { %v2090_v42 = vpop.permute.xlu0 %177 }
  0xa6   :  { %v2096_v44 = vpop.permute.xlu1 %180  ;;  %vm208_vm10 = vcmp.eq.s32.totalorder %v2080_v26, %v2090_v42 }
  0xa7   :  { %v2119_v51 = vsel %vm208_vm10, 1.0, %v1975_v28  ;;  %vm209_vm11 = vcmp.eq.s32.totalorder %v2080_v26, %v2096_v44 }
  0xa8   :  { %v2134_v53 = vsel %vm209_vm11, 1.0, %v1975_v28 }
  0xa9   :  { %v2103_v46 = vpop.permute.xlu0 %183 }
  0xaa   :  { %v2111_v49 = vpop.permute.xlu1 %186  ;;  %vm210_vm12 = vcmp.eq.s32.totalorder %v2080_v26, %v2103_v46 }
  0xab   :  { %v2142_v55 = vsel %vm210_vm12, 1.0, %v1975_v28  ;;  %vm211_vm13 = vcmp.eq.s32.totalorder %v2080_v26, %v2111_v49 }
  0xac   :  { %v2158_v57 = vsel %vm211_vm13, 1.0, %v1975_v28 }
  0xad   :  { %v2123_v52 = vpop.permute.xlu0 %189 }
  0xae   :  { %v2136_v54 = vpop.permute.xlu1 %192  ;;  %vm212_vm14 = vcmp.eq.s32.totalorder %v2080_v26, %v2123_v52 }
  0xaf   :  { %v2164_v58 = vsel %vm212_vm14, 1.0, %v1975_v28  ;;  %vm213_vm15 = vcmp.eq.s32.totalorder %v2080_v26, %v2136_v54 }
  0xb0   :  { %v2180_v60 = vsel %vm213_vm15, 1.0, %v1975_v28 }
  0xb1   :  { %v2152_v56 = vpop.permute.xlu0 %195 }
  0xb2   :  { %vm214_vm0 = vcmp.eq.s32.totalorder %v2080_v26, %v2152_v56  ;;  %v2172_v59 = vpop.permute.xlu1 %198 }
  0xb3   :  { %v2186_v61 = vsel %vm214_vm0, 1.0, %v1975_v28  ;;  %vm215_vm2 = vcmp.eq.s32.totalorder %v2080_v26, %v2172_v59 }
  0xb4   :  { %v2198_v62 = vsel %vm215_vm2, 1.0, %v1975_v28 }
  0xf1   :  { %v1673_v35 = vpop.f32.mrb[0].mxu0 }
  0xf2   :  { %v125_v36 = vpop.f32.mrb[1].mxu0 }
  0xf3   :  { %v1787_v38 = vpack.c.bf16 %v1673_v35, %v125_v36 }
  0xf5   :  { %1788 = vmatprep.subr.bf16.mxu1 %v1787_v38 }
  0xf6   :  { %1790 = vmatpush3.bf16.msra.mxu1 %v1787_v38 }
  0xf9   :  { %1679 = vmatmul.mubr.msk.f32.vlgmr.msra.gmra.mrb[0].mxu1 %vm248_vm1, %v1539_v41 }
  0xfa   :  { %1681 = vmatprep.mubr.msk.f32.mxu1 %vm248_vm1, %v1540_v40 }
  0xfd   :  { %1682 = vmatmul.mubr.msk.f32.gmra.mrb[2].mxu1 %vm248_vm1, %v1541_v43 }
  0xfe   :  { %1684 = vmatprep.mubr.msk.f32.mxu1 %vm248_vm1, %v1542_v45 }
 0x101   :  { %1685 = vmatmul.mubr.msk.f32.gmra.mrb[4].mxu1 %vm248_vm1, %v1543_v47 }
 0x102   :  { %1687 = vmatprep.mubr.msk.f32.mxu1 %vm248_vm1, %v1544_v48 }
 0x105   :  { %1688 = vmatmul.mubr.msk.f32.gmra.mrb[6].mxu1 %vm248_vm1, %v1545_v50 }
 0x106   :  { %1690 = vmatprep.mubr.msk.f32.mxu1 %vm248_vm1, %v2119_v51 }
 0x109   :  { %1691 = vmatmul.mubr.msk.f32.gmra.mrb[8].mxu1 %vm248_vm1, %v2134_v53 }
 0x10a   :  { %1693 = vmatprep.mubr.msk.f32.mxu1 %vm248_vm1, %v2142_v55 }
 0x10d   :  { %1694 = vmatmul.mubr.msk.f32.gmra.mrb[10].mxu1 %vm248_vm1, %v2158_v57 }
 0x10e   :  { %1696 = vmatprep.mubr.msk.f32.mxu1 %vm248_vm1, %v2164_v58 }
 0x111   :  { %1697 = vmatmul.mubr.msk.f32.gmra.mrb[12].mxu1 %vm248_vm1, %v2180_v60 }
 0x112   :  { %1699 = vmatprep.mubr.msk.f32.mxu1 %vm248_vm1, %v2186_v61 }
 0x115   :  { %1700 = vmatmul.mubr.msk.f32.gmra.mrb[14].mxu1 %vm248_vm1, %v2198_v62 }
 0x1cc   :  { %v2202_v63 = vpop.f32.mrb[0].mxu1 }
 0x1cd   :  { %v2204_v0 = vpop.f32.mrb[1].mxu1 }
 0x1d0   :  { %v2206_v1 = vpop.f32.mrb[2].mxu1 }
 0x1d1   :  { %v2208_v2 = vpop.f32.mrb[3].mxu1 }
 0x1d4   :  { %v2210_v3 = vpop.f32.mrb[4].mxu1 }
 0x1d5   :  { %v2212_v4 = vpop.f32.mrb[5].mxu1 }
 0x1d8   :  { %v2214_v5 = vpop.f32.mrb[6].mxu1 }
 0x1d9   :  { %v2216_v6 = vpop.f32.mrb[7].mxu1 }
 0x1dc   :  { %v2218_v7 = vpop.f32.mrb[8].mxu1 }
 0x1dd   :  { %v2222_v8 = vsub.f32 %v2218_v7, %v2202_v63  ;;  %v2224_v9 = vpop.f32.mrb[9].mxu1 }
 0x1de   :  { %v2228_v10 = vsub.f32 %v2224_v9, %v2204_v0 }
 0x1df   :  { %v515_v11 = vmul.f32 %v2222_v8, %v2222_v8 }
 0x1e0   :  { %v514_v12 = vmul.f32 %v2228_v10, %v2228_v10  ;;  %v2234_v13 = vpop.f32.mrb[10].mxu1 }
 0x1e1   :  { %v2238_v14 = vsub.f32 %v2234_v13, %v2206_v1  ;;  %532 = vrot.lane.b32.xlu1 %v515_v11, %s1976_s1  ;;  %v2241_v15 = vpop.f32.mrb[11].mxu1 }
 0x1e2   :  { %v2245_v16 = vsub.f32 %v2241_v15, %v2208_v2  ;;  %530 = vrot.lane.b32.xlu0 %v514_v12, %s1976_s1 }
 0x1e3   :  { %v517_v17 = vmul.f32 %v2238_v14, %v2238_v14 }
 0x1e4   :  { %v516_v18 = vmul.f32 %v2245_v16, %v2245_v16  ;;  %v2252_v19 = vpop.f32.mrb[12].mxu1 }
 0x1e5   :  { %v2256_v20 = vsub.f32 %v2252_v19, %v2210_v3  ;;  %536 = vrot.lane.b32.xlu1 %v517_v17, %s1976_s1  ;;  %v2259_v21 = vpop.f32.mrb[13].mxu1 }
 0x1e6   :  { %v2263_v22 = vsub.f32 %v2259_v21, %v2212_v4  ;;  %534 = vrot.lane.b32.xlu0 %v516_v18, %s1976_s1 }
 0x1e7   :  { %v519_v23 = vmul.f32 %v2256_v20, %v2256_v20 }
 0x1e8   :  { %v518_v24 = vmul.f32 %v2263_v22, %v2263_v22  ;;  %v2270_v27 = vpop.f32.mrb[14].mxu1 }
 0x1e9   :  { %v2274_v29 = vsub.f32 %v2270_v27, %v2214_v5  ;;  %540 = vrot.lane.b32.xlu1 %v519_v23, %s1976_s1  ;;  %v2277_v30 = vpop.f32.mrb[15].mxu1 }
 0x1ea   :  { %v2281_v31 = vsub.f32 %v2277_v30, %v2216_v6  ;;  %538 = vrot.lane.b32.xlu0 %v518_v24, %s1976_s1 }
 0x1eb   :  { %v521_v32 = vmul.f32 %v2274_v29, %v2274_v29 }
 0x1ec   :  { %v520_v33 = vmul.f32 %v2281_v31, %v2281_v31 }
 0x1ed   :  { %544 = vrot.lane.b32.xlu1 %v521_v32, %s1976_s1 }
 0x1ee   :  { %542 = vrot.lane.b32.xlu0 %v520_v33, %s1976_s1  ;;  %v45_v33 = vld [vmem:[#allocation2 + $0x70] sm:$0x7] }
 0x1ef   :  { %1702 = vmatprep.subr.msk.mxu0 %vm655_vm4, %v45_v33 }
 0x1f0   :  { %1703 = vmatpush3.msk.msra.mxu0 %vm655_vm4, %v45_v33 }
 0x253   :  { %v533_v34 = vpop.permute.xlu1 %532 }
 0x254   :  { %v531_v35 = vpop.permute.xlu0 %530  ;;  %v558_v36 = vsel %vm554_vm3, %v533_v34, 0.0 }
 0x255   :  { %559 = vadd.xlane.f32.xlu1 %v558_v36  ;;  %v555_v37 = vsel %vm554_vm3, %v531_v35, 0.0 }
 0x256   :  { %556 = vadd.xlane.f32.xlu0 %v555_v37 }
 0x257   :  { %v537_v38 = vpop.permute.xlu1 %536 }
 0x258   :  { %v535_v39 = vpop.permute.xlu0 %534  ;;  %v564_v47 = vsel %vm554_vm3, %v537_v38, 0.0 }
 0x259   :  { %v561_v40 = vsel %vm554_vm3, %v535_v39, 0.0 }
 0x25a   :  { %562 = vadd.xlane.f32.xlu0 %v561_v40  ;;  %v596_v40 = vmul.f32 1.7320508, %v2222_v8 }
 0x25b   :  { %v541_v41 = vpop.permute.xlu1 %540 }
 0x25c   :  { %v539_v43 = vpop.permute.xlu0 %538  ;;  %v570_v50 = vsel %vm554_vm3, %v541_v41, 0.0 }
 0x25d   :  { %v567_v45 = vsel %vm554_vm3, %v539_v43, 0.0  ;;  %v595_v43 = vmul.f32 1.7320508, %v2228_v10 }
 0x25e   :  { %568 = vadd.xlane.f32.xlu1 %v567_v45  ;;  %565 = vadd.xlane.f32.xlu0 %v564_v47 }
 0x25f   :  { %v545_v12 = vpop.permute.xlu1 %544 }
 0x260   :  { %v543_v48 = vpop.permute.xlu0 %542  ;;  %v576_v17 = vsel %vm554_vm3, %v545_v12, 0.0 }
 0x261   :  { %v573_v11 = vsel %vm554_vm3, %v543_v48, 0.0 }
 0x262   :  { %571 = vadd.xlane.f32.xlu0 %v570_v50  ;;  %574 = vadd.xlane.f32.xlu1 %v573_v11 }
 0x266   :  { %577 = vadd.xlane.f32.xlu0 %v576_v17 }
 0x2e2   :  { %v560_v18 = vpop.xlane.xlu1 %559 }
 0x2e3   :  { %v580_v23 = vadd.f32 1e-12, %v560_v18  ;;  %v557_v24 = vpop.xlane.xlu0 %556  ;;  %v597_v18 = vmul.f32 1.7320508, %v2245_v16  ;;  %v601_v16 = vmul.f32 1.7320508, %v2281_v31 }
 0x2e4   :  { %v579_v32 = vadd.f32 1e-12, %v557_v24 }
 0x2e5   :  { %1873 = vrsqrt.f32 %v580_v23 }
 0x2e6   :  { %1875 = vrsqrt.f32 %v579_v32  ;;  %v599_v32 = vmul.f32 1.7320508, %v2263_v22 }
 0x2e7   :  { %v563_v34 = vpop.xlane.xlu0 %562 }
 0x2e8   :  { %v581_v35 = vadd.f32 1e-12, %v563_v34  ;;  %v598_v34 = vmul.f32 1.7320508, %v2238_v14  ;;  %v602_v14 = vmul.f32 1.7320508, %v2274_v29 }
 0x2ea   :  { %1877 = vrsqrt.f32 %v581_v35 }
 0x2eb   :  { %v569_v36 = vpop.xlane.xlu1 %568  ;;  %v566_v37 = vpop.xlane.xlu0 %565 }
 0x2ec   :  { %v583_v38 = vadd.f32 1e-12, %v569_v36  ;;  %v582_v39 = vadd.f32 1e-12, %v566_v37 }
 0x2ee   :  { %1879 = vrsqrt.f32 %v583_v38  ;;  %v1977_v38 = vmov 83  }
 0x2ef   :  { %v1874_v41 = vpop.eup %1873  ;;  %1881 = vrsqrt.f32 %v582_v39  ;;  %v575_v45 = vpop.xlane.xlu1 %574  ;;  %1851 = vset.pattern.permute.xlu1 %v1977_v38  ;;  %1850 = vset.pattern.permute.xlu0 %v1977_v38 }
 0x2f0   :  { %v572_v47 = vpop.xlane.xlu0 %571  ;;  %v1876_v48 = vpop.eup %1875  ;;  %v585_v50 = vadd.f32 1e-12, %v575_v45  ;;  %v604_v12 = vmul.f32 %v1874_v41, %v596_v40  ;;  %v600_v40 = vmul.f32 1.7320508, %v2256_v20 }
 0x2f1   :  { %v584_v11 = vadd.f32 1e-12, %v572_v47  ;;  %v603_v17 = vmul.f32 %v1876_v48, %v595_v43 }
 0x2f2   :  { %1883 = vrsqrt.f32 %v585_v50  ;;  %625 = vrot.lane.b32.xlu0 %v604_v12, %s1976_s1 }
 0x2f3   :  { %1885 = vrsqrt.f32 %v584_v11  ;;  %623 = vrot.lane.b32.xlu1 %v603_v17, %s1976_s1 }
 0x2f4   :  { %v578_v8 = vpop.xlane.xlu0 %577  ;;  %v1878_v23 = vpop.eup %1877 }
 0x2f5   :  { %v586_v24 = vadd.f32 1e-12, %v578_v8  ;;  %v605_v10 = vmul.f32 %v1878_v23, %v597_v18 }
 0x2f7   :  { %1887 = vrsqrt.f32 %v586_v24  ;;  %627 = vrot.lane.b32.xlu1 %v605_v10, %s1976_s1 }
 0x2f8   :  { %v1880_v33 = vpop.eup %1879 }
 0x2f9   :  { %v1882_v35 = vpop.eup %1881  ;;  %v607_v36 = vmul.f32 %v1880_v33, %v599_v32 }
 0x2fa   :  { %v606_v37 = vmul.f32 %v1882_v35, %v598_v34 }
 0x2fb   :  { %631 = vrot.lane.b32.xlu0 %v607_v36, %s1976_s1 }
 0x2fc   :  { %v1884_v39 = vpop.eup %1883  ;;  %629 = vrot.lane.b32.xlu1 %v606_v37, %s1976_s1 }
 0x2fd   :  { %v1886_v22 = vpop.eup %1885  ;;  %v609_v41 = vmul.f32 %v1884_v39, %v601_v16 }
 0x2fe   :  { %v608_v43 = vmul.f32 %v1886_v22, %v600_v40 }
 0x2ff   :  { %635 = vrot.lane.b32.xlu0 %v609_v41, %s1976_s1 }
 0x300   :  { %633 = vrot.lane.b32.xlu1 %v608_v43, %s1976_s1 }
 0x301   :  { %v1888_v45 = vpop.eup %1887 }
 0x302   :  { %v610_v31 = vmul.f32 %v1888_v45, %v602_v14 }
 0x303   :  { %458 = vrot.lane.b32.xlu0 %v2204_v0, %s1978_s8 }
 0x304   :  { %637 = vrot.lane.b32.xlu1 %v610_v31, %s1976_s1 }
 0x307   :  { %462 = vrot.lane.b32.xlu0 %v2208_v2, %s1978_s8 }
 0x308   :  { %460 = vrot.lane.b32.xlu1 %v2202_v63, %s1978_s8 }
 0x30b   :  { %466 = vrot.lane.b32.xlu0 %v2212_v4, %s1978_s8 }
 0x30c   :  { %464 = vrot.lane.b32.xlu1 %v2206_v1, %s1978_s8 }
 0x30f   :  { %470 = vrot.lane.b32.xlu0 %v2216_v6, %s1978_s8 }
 0x310   :  { %468 = vrot.lane.b32.xlu1 %v2210_v3, %s1978_s8 }
 0x314   :  { %472 = vrot.lane.b32.xlu1 %v2214_v5, %s1978_s8 }
 0x364   :  { %v626_v29 = vpop.permute.xlu0 %625 }
 0x365   :  { %v624_v20 = vpop.permute.xlu1 %623 }
 0x366   :  { %1704 = vmatprep.mubr.msk.f32.mxu0 %vm554_vm3, %v624_v20 }
 0x367   :  { %1705 = vmatmul.mubr.msk.f32.vlgmr.msra.gmra.mrb[2].mxu0 %vm554_vm3, %v626_v29 }
 0x369   :  { %v628_v47 = vpop.permute.xlu1 %627 }
 0x36a   :  { %1707 = vmatprep.mubr.msk.f32.mxu0 %vm554_vm3, %v628_v47 }
 0x36d   :  { %v632_v48 = vpop.permute.xlu0 %631 }
 0x36e   :  { %v630_v50 = vpop.permute.xlu1 %629 }
 0x36f   :  { %1708 = vmatmul.mubr.msk.f32.gmra.mrb[4].mxu0 %vm554_vm3, %v630_v50  ;;  %v36_v50 = vld [vmem:[#allocation2 + $0x28] sm:$0xff] }
 0x370   :  { %1710 = vmatprep.mubr.msk.f32.mxu0 %vm554_vm3, %v632_v48 }
 0x371   :  { %v636_v11 = vpop.permute.xlu0 %635 }
 0x372   :  { %v634_v12 = vpop.permute.xlu1 %633 }
 0x373   :  { %1711 = vmatmul.mubr.msk.f32.gmra.mrb[6].mxu0 %vm554_vm3, %v634_v12  ;;  %v37_v12 = vld [vmem:[#allocation2 + $0x30] sm:$0xff] }
 0x374   :  { %1713 = vmatprep.mubr.msk.f32.mxu0 %vm554_vm3, %v636_v11 }
 0x375   :  { %v459_v17 = vpop.permute.xlu0 %458 }
 0x376   :  { %v638_v18 = vpop.permute.xlu1 %637  ;;  %v482_v8 = vadd.f32 %v459_v17, %v2224_v9  ;;  %v38_v17 = vld [vmem:[#allocation2 + $0x38] sm:$0xff] }
 0x377   :  { %1714 = vmatmul.mubr.msk.f32.gmra.mrb[8].mxu0 %vm554_vm3, %v638_v18  ;;  %v39_v18 = vld [vmem:[#allocation2 + $0x40] sm:$0xff] }
 0x378   :  { %v498_v23 = vmul.f32 0.2, %v482_v8  ;;  %vm490_vm5 = vcmp.gt.f32.partialorder %v482_v8, 0.0 }
 0x379   :  { %v463_v24 = vpop.permute.xlu0 %462 }
 0x37a   :  { %v461_v10 = vpop.permute.xlu1 %460  ;;  %v484_v32 = vadd.f32 %v463_v24, %v2241_v15  ;;  %v2332_v33 = vsel %vm490_vm5, %v482_v8, %v498_v23  ;;  %v1795_v8 = vpack.c.bf16 %v38_v17, %v37_v12  ;;  %v40_v23 = vld [vmem:[#allocation2 + $0x48] sm:$0xff] }
 0x37b   :  { %v483_v34 = vadd.f32 %v2218_v7, %v461_v10  ;;  %904 = vperm.xlu0 %1850, %v2332_v33   ;;  %v1799_v24 = vpack.c.bf16 %v40_v23, %v39_v18  ;;  %v41_v10 = vld [vmem:[#allocation2 + $0x50] sm:$0xff] }
 0x37c   :  { %v500_v37 = vmul.f32 0.2, %v484_v32  ;;  %vm492_vm7 = vcmp.gt.f32.partialorder %v484_v32, 0.0 }
 0x37d   :  { %v499_v35 = vmul.f32 0.2, %v483_v34  ;;  %v467_v36 = vpop.permute.xlu0 %466  ;;  %vm491_vm6 = vcmp.gt.f32.partialorder %v483_v34, 0.0 }
 0x37e   :  { %v465_v16 = vpop.permute.xlu1 %464  ;;  %v486_v38 = vadd.f32 %v467_v36, %v2259_v21  ;;  %v2341_v22 = vsel %vm492_vm7, %v484_v32, %v500_v37  ;;  %v42_v32 = vld [vmem:[#allocation2 + $0x58] sm:$0xff]  ;;  %v44_v36 = vld [vmem:[#allocation2 + $0x68] sm:$0xff]  ;;  %vm1298_vm7 = vcmask 97280  }
 0x37f   :  { %v485_v9 = vadd.f32 %v2234_v13, %v465_v16  ;;  %v2338_v39 = vsel %vm491_vm6, %v483_v34, %v499_v35  ;;  %v1803_v34 = vpack.c.bf16 %v42_v32, %v41_v10  ;;  %v43_v35 = vld [vmem:[#allocation2 + $0x60] sm:$0xff]  ;;  %vm1413_vm6 = vcmask 31744  }
 0x380   :  { %909 = vperm.xlu1 %1851, %v2338_v39   ;;  %v502_v41 = vmul.f32 0.2, %v486_v38  ;;  %vm494_vm9 = vcmp.gt.f32.partialorder %v486_v38, 0.0  ;;  %v1807_v37 = vpack.c.bf16 %v44_v36, %v43_v35 }
 0x381   :  { %v501_v15 = vmul.f32 0.2, %v485_v9  ;;  %v471_v40 = vpop.permute.xlu0 %470  ;;  %vm493_vm8 = vcmp.gt.f32.partialorder %v485_v9, 0.0 }
 0x382   :  { %v469_v7 = vpop.permute.xlu1 %468  ;;  %v488_v14 = vadd.f32 %v471_v40, %v2277_v30  ;;  %v2352_v47 = vsel %vm494_vm9, %v486_v38, %v502_v41 }
 0x383   :  { %v487_v43 = vadd.f32 %v2252_v19, %v469_v7  ;;  %v2345_v45 = vsel %vm493_vm8, %v485_v9, %v501_v15  ;;  %vm1516_vm8 = vcmask 130080  }
 0x384   :  { %919 = vperm.xlu0 %1850, %v2345_v45   ;;  %914 = vperm.xlu1 %1851, %v2341_v22   ;;  %v504_v31 = vmul.f32 0.2, %v488_v14  ;;  %vm496_vm4 = vcmp.gt.f32.partialorder %v488_v14, 0.0 }
 0x385   :  { %v503_v13 = vmul.f32 0.2, %v487_v43  ;;  %vm495_vm3 = vcmp.gt.f32.partialorder %v487_v43, 0.0 }
 0x386   :  { %v473_v21 = vpop.permute.xlu1 %472  ;;  %v2358_v48 = vsel %vm496_vm4, %v488_v14, %v504_v31 }
 0x387   :  { %v489_v20 = vadd.f32 %v2270_v27, %v473_v21  ;;  %v2350_v29 = vsel %vm495_vm3, %v487_v43, %v503_v13  ;;  %v35_v27 = vld [vmem:[#allocation2 + $0x20] sm:$0xff] }
 0x388   :  { %929 = vperm.xlu0 %1850, %v2350_v29   ;;  %924 = vperm.xlu1 %1851, %v2352_v47   ;;  %v1791_v11 = vpack.c.bf16 %v36_v50, %v35_v27 }
 0x389   :  { %v505_v19 = vmul.f32 0.2, %v489_v20  ;;  %vm497_vm5 = vcmp.gt.f32.partialorder %v489_v20, 0.0 }
 0x38a   :  { %1792 = vmatprep.subr.bf16.mxu0 %v1791_v11 }
 0x38b   :  { %v2356_v30 = vsel %vm497_vm5, %v489_v20, %v505_v19  ;;  %1794 = vmatpush3.bf16.msra.mxu0 %v1791_v11 }
 0x38c   :  { %939 = vperm.xlu0 %1850, %v2356_v30   ;;  %934 = vperm.xlu1 %1851, %v2358_v48  }
 0x38d   :  { %1796 = vmatprep.subr.bf16.mxu0 %v1795_v8 }
 0x38f   :  { %1798 = vmatpush3.bf16.msra.mxu0 %v1795_v8 }
 0x390   :  { %1800 = vmatprep.subr.bf16.mxu0 %v1799_v24 }
 0x393   :  { %1802 = vmatpush3.bf16.msra.mxu0 %v1799_v24 }
 0x394   :  { %1804 = vmatprep.subr.bf16.mxu0 %v1803_v34 }
 0x397   :  { %1806 = vmatpush3.bf16.msra.mxu0 %v1803_v34 }
 0x398   :  { %1808 = vmatprep.subr.bf16.mxu0 %v1807_v37 }
 0x39b   :  { %1810 = vmatpush3.bf16.msra.mxu0 %v1807_v37 }
 0x3fa   :  { %v905_v16 = vpop.permute.xlu0 %904 }
 0x3fb   :  { %v942_v40 = vsel %vm208_vm10, %v905_v16, -1e+30  ;;  %vm772_vm10 = vcmask 654336  }
 0x3fc   :  { %v950_v20 = vsel %vm248_vm1, %v942_v40, -inf }
 0x3ff   :  { %v910_v9 = vpop.permute.xlu1 %909 }
 0x400   :  { %v943_v43 = vsel %vm209_vm11, %v910_v9, -1e+30  ;;  %vm1140_vm11 = vcmask 523264  }
 0x401   :  { %v951_v52 = vsel %vm248_vm1, %v943_v43, -inf }
 0x403   :  { %v915_v38 = vpop.permute.xlu1 %914  ;;  %v920_v15 = vpop.permute.xlu0 %919 }
 0x404   :  { %v944_v42 = vsel %vm210_vm12, %v915_v38, -1e+30  ;;  %v945_v44 = vsel %vm211_vm13, %v920_v15, -1e+30  ;;  %vm1301_vm12 = vcmask 1043456   ;;  %vm1982_vm13 = vmmov 1  }
 0x405   :  { %v952_v12 = vsel %vm248_vm1, %v944_v42, -inf  ;;  %v953_v49 = vsel %vm248_vm1, %v945_v44, -inf }
 0x407   :  { %v925_v7 = vpop.permute.xlu1 %924  ;;  %v930_v41 = vpop.permute.xlu0 %929 }
 0x408   :  { %v946_v14 = vsel %vm212_vm14, %v925_v7, -1e+30  ;;  %v947_v13 = vsel %vm213_vm15, %v930_v41, -1e+30  ;;  %vm1829_vm14 = vmpackc.low %vm1301_vm12, %vm1982_vm13  ;;  %vm1983_vm15 = vmmov 0  }
 0x409   :  { %v954_v21 = vsel %vm248_vm1, %v946_v14, -inf  ;;  %v956_v31 = vsel %vm248_vm1, %v947_v13, -inf }
 0x40a   :  { %v955_v54 = vmax.f32 %v950_v20, %v954_v21  ;;  %v957_v50 = vmax.f32 %v951_v52, %v956_v31  ;;  %v1570_v52 = vld [vmem:[#allocation2 + $0x78] ss:$0 sm:$0xff] }
 0x40b   :  { %v935_v19 = vpop.permute.xlu1 %934  ;;  %v940_v27 = vpop.permute.xlu0 %939 }
 0x40c   :  { %v948_v11 = vsel %vm214_vm0, %v935_v19, -1e+30  ;;  %v949_v46 = vsel %vm215_vm2, %v940_v27, -1e+30  ;;  %v962_v24 = vmax.f32 %v955_v54, %v957_v50  ;;  %vm1240_vm0 = vcmask 64512  }
 0x40d   :  { %v958_v17 = vsel %vm248_vm1, %v948_v11, -inf  ;;  %v960_v18 = vsel %vm248_vm1, %v949_v46, -inf  ;;  %vm1284_vm2 = vcmask 162880  }
 0x40e   :  { %v959_v8 = vmax.f32 %v952_v12, %v958_v17  ;;  %v961_v23 = vmax.f32 %v953_v49, %v960_v18 }
 0x410   :  { %v963_v10 = vmax.f32 %v959_v8, %v961_v23 }
 0x412   :  { %v964_v32 = vmax.f32 %v962_v24, %v963_v10 }
 0x414   :  { %v965_v34 = vrot.slane %v964_v32, 4 }
 0x416   :  { %v966_v56 = vmax.f32 %v964_v32, %v965_v34 }
 0x418   :  { %v967_v35 = vrot.slane %v966_v56, 2 }
 0x41a   :  { %v968_v36 = vmax.f32 %v966_v56, %v967_v35 }
 0x41c   :  { %v969_v37 = vrot.slane %v968_v36, 1 }
 0x41e   :  { %v970_v26 = vmax.f32 %v968_v36, %v969_v37 }
 0x420   :  { %v972_v59 = vmul.f32 %v2134_v53, %v970_v26  ;;  %v971_v16 = vmul.f32 %v2119_v51, %v970_v26  ;;  %v973_v15 = vmul.f32 %v2142_v55, %v970_v26  ;;  %v974_v40 = vmul.f32 %v2158_v57, %v970_v26 }
 0x421   :  { %v975_v43 = vmul.f32 %v2164_v58, %v970_v26  ;;  %v976_v14 = vmul.f32 %v2180_v60, %v970_v26  ;;  %v977_v31 = vmul.f32 %v2186_v61, %v970_v26  ;;  %v978_v42 = vmul.f32 %v2198_v62, %v970_v26 }
 0x422   :  { %v982_v9 = vsel %vm248_vm1, %v972_v59, 0.0  ;;  %v979_v38 = vsel %vm248_vm1, %v971_v16, 0.0  ;;  %v985_v7 = vsel %vm248_vm1, %v973_v15, 0.0  ;;  %v988_v41 = vsel %vm248_vm1, %v974_v40, 0.0 }
 0x423   :  { %983 = vadd.xlane.f32.xlu0 %v982_v9  ;;  %980 = vadd.xlane.f32.xlu1 %v979_v38  ;;  %v991_v13 = vsel %vm248_vm1, %v975_v43, 0.0  ;;  %v994_v21 = vsel %vm248_vm1, %v976_v14, 0.0  ;;  %v997_v44 = vsel %vm248_vm1, %v977_v31, 0.0  ;;  %v1000_v20 = vsel %vm248_vm1, %v978_v42, 0.0 }
 0x424   :  { %vm1099_vm1 = vcmask 162816  }
 0x427   :  { %986 = vadd.xlane.f32.xlu0 %v985_v7  ;;  %989 = vadd.xlane.f32.xlu1 %v988_v41 }
 0x42b   :  { %992 = vadd.xlane.f32.xlu0 %v991_v13  ;;  %995 = vadd.xlane.f32.xlu1 %v994_v21 }
 0x42f   :  { %998 = vadd.xlane.f32.xlu0 %v997_v44  ;;  %1001 = vadd.xlane.f32.xlu1 %v1000_v20 }
 0x43a   :  { %v1706_v19 = vpop.f32.mrb[2].mxu0 }
 0x43b   :  { %v731_v27 = vadd.f32 %v1706_v19, %v1570_v52  ;;  %v725_v54 = vpop.f32.mrb[3].mxu0 }
 0x43c   :  { %v726_v50 = vadd.f32 %v1570_v52, %v725_v54 }
 0x43d   :  { %v765_v11 = vmul.f32 %v2202_v63, %v731_v27 }
 0x43e   :  { %v764_v46 = vmul.f32 %v726_v50, %v2204_v0 }
 0x440   :  { %1736 = vmatprep.mubr.msk.f32.mxu0 %vm772_vm10, %v764_v46 }
 0x441   :  { %1737 = vmatmul.mubr.msk.f32.vlgmr.msra.gmra.mrb[10].mxu0 %vm772_vm10, %v765_v11 }
 0x442   :  { %v1709_v12 = vpop.f32.mrb[4].mxu0 }
 0x443   :  { %v741_v49 = vadd.f32 %v1709_v12, %v1570_v52  ;;  %v735_v17 = vpop.f32.mrb[5].mxu0 }
 0x444   :  { %v736_v18 = vadd.f32 %v1570_v52, %v735_v17 }
 0x445   :  { %v767_v8 = vmul.f32 %v2206_v1, %v741_v49 }
 0x446   :  { %v766_v23 = vmul.f32 %v736_v18, %v2208_v2  ;;  %v1712_v24 = vpop.f32.mrb[6].mxu0 }
 0x447   :  { %v751_v10 = vadd.f32 %v1712_v24, %v1570_v52  ;;  %v745_v32 = vpop.f32.mrb[7].mxu0 }
 0x448   :  { %v746_v34 = vadd.f32 %v1570_v52, %v745_v32  ;;  %1739 = vmatprep.mubr.msk.f32.mxu0 %vm772_vm10, %v766_v23 }
 0x449   :  { %v769_v63 = vmul.f32 %v2210_v3, %v751_v10  ;;  %1740 = vmatmul.mubr.msk.f32.gmra.mrb[12].mxu0 %vm772_vm10, %v767_v8 }
 0x44a   :  { %v768_v0 = vmul.f32 %v746_v34, %v2212_v4  ;;  %v1715_v56 = vpop.f32.mrb[8].mxu0 }
 0x44b   :  { %v761_v35 = vadd.f32 %v1715_v56, %v1570_v52  ;;  %v755_v36 = vpop.f32.mrb[9].mxu0 }
 0x44c   :  { %v756_v37 = vadd.f32 %v1570_v52, %v755_v36  ;;  %1742 = vmatprep.mubr.msk.f32.mxu0 %vm772_vm10, %v768_v0 }
 0x44d   :  { %v771_v1 = vmul.f32 %v2214_v5, %v761_v35  ;;  %1743 = vmatmul.mubr.msk.f32.gmra.mrb[14].mxu0 %vm772_vm10, %v769_v63 }
 0x44e   :  { %v770_v2 = vmul.f32 %v756_v37, %v2216_v6 }
 0x450   :  { %1745 = vmatprep.mubr.msk.f32.mxu0 %vm772_vm10, %v770_v2 }
 0x451   :  { %1746 = vmatmul.mubr.msk.f32.gmra.mrb[16].mxu0 %vm772_vm10, %v771_v1 }
 0x4b0   :  { %v984_v3 = vpop.xlane.xlu0 %983  ;;  %v981_v26 = vpop.xlane.xlu1 %980 }
 0x4b1   :  { %v1004_v4 = vsub.f32 %v2338_v39, %v984_v3  ;;  %v1003_v59 = vsub.f32 %v2332_v33, %v981_v26 }
 0x4b3   :  { %v1013_v16 = vmul.f32 1.442695, %v1004_v4  ;;  %v1011_v9 = vmul.f32 1.442695, %v1003_v59 }
 0x4b4   :  { %v987_v38 = vpop.xlane.xlu0 %986  ;;  %v990_v15 = vpop.xlane.xlu1 %989 }
 0x4b5   :  { %1889 = vpow2.f32 %v1013_v16  ;;  %v1005_v5 = vsub.f32 %v2341_v22, %v987_v38  ;;  %v1006_v40 = vsub.f32 %v2345_v45, %v990_v15 }
 0x4b6   :  { %1891 = vpow2.f32 %v1011_v9 }
 0x4b7   :  { %v1015_v6 = vmul.f32 1.442695, %v1005_v5  ;;  %v1017_v7 = vmul.f32 1.442695, %v1006_v40 }
 0x4b8   :  { %v993_v41 = vpop.xlane.xlu0 %992  ;;  %v996_v43 = vpop.xlane.xlu1 %995 }
 0x4b9   :  { %1893 = vpow2.f32 %v1015_v6  ;;  %v1007_v14 = vsub.f32 %v2352_v47, %v993_v41  ;;  %v1008_v39 = vsub.f32 %v2350_v29, %v996_v43 }
 0x4ba   :  { %1895 = vpow2.f32 %v1017_v7 }
 0x4bb   :  { %v1019_v33 = vmul.f32 1.442695, %v1007_v14  ;;  %v1021_v13 = vmul.f32 1.442695, %v1008_v39 }
 0x4bc   :  { %v999_v21 = vpop.xlane.xlu0 %998  ;;  %v1002_v31 = vpop.xlane.xlu1 %1001 }
 0x4bd   :  { %1897 = vpow2.f32 %v1019_v33  ;;  %v1009_v22 = vsub.f32 %v2358_v48, %v999_v21  ;;  %v1010_v45 = vsub.f32 %v2356_v30, %v1002_v31 }
 0x4be   :  { %1899 = vpow2.f32 %v1021_v13 }
 0x4bf   :  { %v1890_v42 = vpop.eup %1889  ;;  %v1023_v44 = vmul.f32 1.442695, %v1009_v22  ;;  %v1025_v52 = vmul.f32 1.442695, %v1010_v45 }
 0x4c0   :  { %v1892_v20 = vpop.eup %1891  ;;  %1034 = vperm.xlu1 %1851, %v1890_v42  }
 0x4c1   :  { %1901 = vpow2.f32 %v1023_v44  ;;  %1029 = vperm.xlu0 %1850, %v1892_v20   ;;  %v1852_v48 = vpack.i.bf16 %v1890_v42, %v1892_v20  ;;  %v1980_v20 = vmov 20  }
 0x4c2   :  { %1903 = vpow2.f32 %v1025_v52 }
 0x4c3   :  { %v1894_v47 = vpop.eup %1893 }
 0x4c4   :  { %v1896_v29 = vpop.eup %1895  ;;  %1039 = vperm.xlu1 %1851, %v1894_v47  }
 0x4c5   :  { %1044 = vperm.xlu0 %1850, %v1896_v29   ;;  %v1857_v50 = vpack.i.bf16 %v1896_v29, %v1894_v47 }
 0x4c7   :  { %v1898_v19 = vpop.eup %1897 }
 0x4c8   :  { %v1900_v27 = vpop.eup %1899  ;;  %1049 = vperm.xlu1 %1851, %v1898_v19  }
 0x4c9   :  { %1054 = vperm.xlu0 %1850, %v1900_v27   ;;  %v1862_v11 = vpack.i.bf16 %v1900_v27, %v1898_v19  ;;  %v47_v27 = vld [vmem:[#allocation2 + $0x80] sm:$0xff] }
 0x4cb   :  { %v1902_v54 = vpop.eup %1901 }
 0x4cc   :  { %1853 = vrot.lane.b32.xlu1 %v1852_v48, %s1979_s9  ;;  %v1904_v30 = vpop.eup %1903  ;;  %v48_v48 = vld [vmem:[#allocation2 + $0x88] sm:$0xf] }
 0x4cd   :  { %1059 = vperm.xlu0 %1850, %v1902_v54   ;;  %v1867_v46 = vpack.i.bf16 %v1904_v30, %v1902_v54  ;;  %v1981_v54 = vmov 0.0|0.0  }
 0x4d0   :  { %1064 = vperm.xlu1 %1851, %v1904_v30   ;;  %v1828_v30 = vpack.c.bf16 %v48_v48, %v47_v27 }
 0x4d1   :  { %1858 = vrot.lane.b32.xlu0 %v1857_v50, %s1979_s9 }
 0x4d2   :  { %1872 = vset.pattern.permute.xlu0 %v1980_v20  ;;  %v1590_v20 = vld [vmem:[#allocation2 + $0xa0] ss:$0 sm:$0xff] }
 0x4d4   :  { %1863 = vrot.lane.b32.xlu1 %v1862_v11, %s1979_s9 }
 0x4d5   :  { %1868 = vrot.lane.b32.xlu0 %v1867_v46, %s1979_s9 }
 0x4fd   :  { %1108 = vxpose.xlu1.b32.start [1/8] (short) (narrow) %v2119_v51, 16 }
 0x501   :  { %1109 = vxpose.xlu1.b32.cont [2/8] (short) (narrow) %v2134_v53, 16 }
 0x505   :  { %1110 = vxpose.xlu1.b32.cont [3/8] (short) (narrow) %v2142_v55, 16 }
 0x509   :  { %1111 = vxpose.xlu1.b32.cont [4/8] (short) (narrow) %v2158_v57, 16 }
 0x50d   :  { %1112 = vxpose.xlu1.b32.cont [5/8] (short) (narrow) %v2164_v58, 16 }
 0x511   :  { %1113 = vxpose.xlu1.b32.cont [6/8] (short) (narrow) %v2180_v60, 16 }
 0x514   :  { %v1738_v12 = vpop.f32.mrb[10].mxu0 }
 0x515   :  { %1114 = vxpose.xlu1.b32.cont [7/8] (short) (narrow) %v2186_v61, 16  ;;  %v863_v49 = vpop.f32.mrb[11].mxu0 }
 0x519   :  { %1115 = vxpose.xlu1.b32.end [8/8] (short) (narrow) %v2198_v62, 16 }
 0x51c   :  { %v1741_v17 = vpop.f32.mrb[12].mxu0 }
 0x51d   :  { %v873_v18 = vpop.f32.mrb[13].mxu0 }
 0x520   :  { %v1744_v8 = vpop.f32.mrb[14].mxu0 }
 0x521   :  { %v883_v51 = vpop.f32.mrb[15].mxu0 }
 0x524   :  { %v1747_v23 = vpop.f32.mrb[16].mxu0 }
 0x525   :  { %v893_v53 = vpop.f32.mrb[17].mxu0 }
 0x53f   :  { %v1035_v24 = vpop.permute.xlu1 %1034 }
 0x540   :  { %v1030_v55 = vpop.permute.xlu0 %1029  ;;  %v1068_v63 = vmul.f32 %v1738_v12, %v1035_v24 }
 0x541   :  { %v1067_v60 = vmul.f32 %v1030_v55, %v863_v49  ;;  %v1921_v49 = vld [vmem:[%s2500_s0] sm:$0xff] }
 0x543   :  { %v1040_v10 = vpop.permute.xlu1 %1039 }
 0x544   :  { %v1045_v57 = vpop.permute.xlu0 %1044  ;;  %v1069_v3 = vmul.f32 %v1040_v10, %v873_v18 }
 0x545   :  { %v1070_v2 = vmul.f32 %v1741_v17, %v1045_v57 }
 0x547   :  { %v1050_v32 = vpop.permute.xlu1 %1049 }
 0x548   :  { %v1055_v58 = vpop.permute.xlu0 %1054  ;;  %v1071_v59 = vmul.f32 %v1050_v32, %v883_v51 }
 0x549   :  { %v1072_v15 = vmul.f32 %v1744_v8, %v1055_v58 }
 0x54b   :  { %v1854_v34 = vpop.permute.xlu1 %1853 }
 0x54c   :  { %v1060_v61 = vpop.permute.xlu0 %1059  ;;  %v1856_v0 = vunpack.i.h.bf16 %v1854_v34  ;;  %v1855_v56 = vunpack.i.l.bf16 %v1854_v34 }
 0x54d   :  { %v1073_v41 = vmul.f32 %v1060_v61, %v893_v53 }
 0x54e   :  { %v1100_v62 = vsel %vm1099_vm1, %v1067_v60, %v1855_v56  ;;  %v1101_v35 = vsel %vm1099_vm1, %v1068_v63, %v1856_v0 }
 0x54f   :  { %v1065_v36 = vpop.permute.xlu1 %1064  ;;  %v1811_v37 = vpack.c.bf16 %v1101_v35, %v1100_v62 }
 0x550   :  { %v1859_v1 = vpop.permute.xlu0 %1858  ;;  %v1074_v43 = vmul.f32 %v1747_v23, %v1065_v36 }
 0x551   :  { %v1861_v26 = vunpack.i.h.bf16 %v1859_v1  ;;  %v1860_v4 = vunpack.i.l.bf16 %v1859_v1  ;;  %1812 = vmatprep.subr.bf16.mxu1 %v1811_v37 }
 0x552   :  { %1814 = vmatpush3.bf16.msra.mxu1 %v1811_v37 }
 0x553   :  { %v1864_v16 = vpop.permute.xlu1 %1863  ;;  %v1102_v9 = vsel %vm1099_vm1, %v1069_v3, %v1860_v4  ;;  %v1103_v38 = vsel %vm1099_vm1, %v1070_v2, %v1861_v26 }
 0x554   :  { %v1869_v5 = vpop.permute.xlu0 %1868  ;;  %v1866_v40 = vunpack.i.h.bf16 %v1864_v16  ;;  %v1865_v6 = vunpack.i.l.bf16 %v1864_v16  ;;  %v1815_v7 = vpack.c.bf16 %v1103_v38, %v1102_v9 }
 0x555   :  { %v1871_v14 = vunpack.i.h.bf16 %v1869_v5  ;;  %v1870_v39 = vunpack.i.l.bf16 %v1869_v5  ;;  %v50_v5 = vld [vmem:[#allocation2 + $0x98] sm:$0x1] }
 0x556   :  { %1816 = vmatprep.subr.bf16.mxu1 %v1815_v7  ;;  %v1104_v33 = vsel %vm1099_vm1, %v1071_v59, %v1865_v6  ;;  %v1105_v13 = vsel %vm1099_vm1, %v1072_v15, %v1866_v40 }
 0x557   :  { %1818 = vmatpush3.bf16.msra.mxu1 %v1815_v7  ;;  %v1819_v21 = vpack.c.bf16 %v1105_v13, %v1104_v33  ;;  %v1106_v31 = vsel %vm1099_vm1, %v1073_v41, %v1870_v39  ;;  %v1107_v22 = vsel %vm1099_vm1, %v1074_v43, %v1871_v14 }
 0x558   :  { %v1823_v45 = vpack.c.bf16 %v1107_v22, %v1106_v31 }
 0x559   :  { %1820 = vmatprep.subr.bf16.mxu1 %v1819_v21 }
 0x55b   :  { %1822 = vmatpush3.bf16.msra.mxu1 %v1819_v21  ;;  %v1271_v21 = vshrl.u32 %v150_v25, 7 }
 0x55c   :  { %1824 = vmatprep.subr.bf16.mxu1 %v1823_v45 }
 0x55d   :  { %v1272_v31 = vsub.s32 0, %v1271_v21 }
 0x55f   :  { %1826 = vmatpush3.bf16.msra.mxu1 %v1823_v45  ;;  %v1273_v22 = vrot.slane %v50_v5, %v1272_v31 }
 0x560   :  { %1827 = vmatprep.subr.bf16.mxu1 %v1981_v54 }
 0x57d   :  { %v1124_v42 = vpop.trf.xlu1 }
 0x57e   :  { %1764 = vmatprep.mubr.msk.f32.mxu1 %vm1140_vm11, %v1124_v42 }
 0x581   :  { %v1125_v44 = vpop.trf.xlu1 }
 0x582   :  { %1765 = vmatmul.mubr.msk.f32.vlgmr.msra.gmra.mrb[16].mxu1 %vm1140_vm11, %v1125_v44 }
 0x583   :  { %1771 = vmatprep.mubr.msk.f32.mxu1 %vm1983_vm15, %v1975_v28  ;;  %1830 = vmatpush3.bf16.msk.msra.mxu1 %vm1829_vm14, %v1828_v30  ;;  %v1922_v28 = vld [vmem:[%s2500_s0 + $0x8] sm:$0xff]  ;;  %s1984_s0 = smov 120  }
 0x655   :  { %v1766_v52 = vpop.f32.mrb[16].mxu1 }
 0x656   :  { %v1213_v47 = vpop.f32.mrb[17].mxu1  ;;  %v1223_v19 = vadd.f32 1e-16, %v1766_v52 }
 0x657   :  { %v1222_v29 = vadd.f32 1e-16, %v1213_v47 }
 0x659   :  { %1226 = vperm.xlu0 %1872, %v1222_v29  }
 0x65d   :  { %1231 = vperm.xlu0 %1872, %v1223_v19  }
 0x6d8   :  { %v1227_v50 = vpop.permute.xlu0 %1226 }
 0x6d9   :  { %1905 = vrcp.f32 %v1227_v50 }
 0x6dc   :  { %v1232_v11 = vpop.permute.xlu0 %1231 }
 0x6dd   :  { %1907 = vrcp.f32 %v1232_v11 }
 0x6e3   :  { %v1906_v46 = vpop.eup %1905 }
 0x6e4   :  { %v1235_v12 = vmul.f32 %v1906_v46, %v1213_v47 }
 0x6e6   :  { %v2455_v17 = vadd.f32 %v1921_v49, %v1235_v12  ;;  %v49_v49 = vld [vmem:[#allocation2 + $0x90] sm:$0xf] }
 0x6e7   :  { %v1908_v18 = vpop.eup %1907  ;;  %1774 = vmatprep.subr.msk.mxu1 %vm1301_vm12, %v49_v49 }
 0x6e8   :  { %v1237_v8 = vmul.f32 %v1908_v18, %v1766_v52  ;;  %v1282_v23 = vmul.f32 %v2455_v17, %v2455_v17  ;;  %v1241_v24 = vsel %vm1240_vm0, %v2455_v17, 0.0 }
 0x6ea   :  { %v2460_v51 = vadd.f32 %v1922_v28, %v1237_v8  ;;  %v1285_v57 = vsel %vm1284_vm2, %v1282_v23, 0.0 }
 0x6ec   :  { %v1283_v53 = vmul.f32 %v2460_v51, %v2460_v51  ;;  %v1242_v55 = vsel %vm1240_vm0, %v2460_v51, 0.0 }
 0x6ed   :  { %v1243_v10 = vadd.f32 %v1242_v55, %v1241_v24 }
 0x6ee   :  { %v1286_v32 = vsel %vm1284_vm2, %v1283_v53, 0.0 }
 0x6ef   :  { %v1287_v58 = vadd.f32 %v1286_v32, %v1285_v57  ;;  %v1244_v34 = vrot.slane %v1243_v10, 4 }
 0x6f1   :  { %v1288_v60 = vrot.slane %v1287_v58, 4  ;;  %v1245_v63 = vadd.f32 %v1244_v34, %v1243_v10 }
 0x6f3   :  { %v1289_v61 = vadd.f32 %v1288_v60, %v1287_v58  ;;  %v1246_v0 = vrot.slane %v1245_v63, 2 }
 0x6f5   :  { %v1290_v56 = vrot.slane %v1289_v61, 2  ;;  %v1247_v62 = vadd.f32 %v1246_v0, %v1245_v63 }
 0x6f7   :  { %v1291_v35 = vadd.f32 %v1290_v56, %v1289_v61  ;;  %v1248_v36 = vrot.slane %v1247_v62, 1 }
 0x6f9   :  { %v1292_v37 = vrot.slane %v1291_v35, 1  ;;  %v1249_v1 = vadd.f32 %v1248_v36, %v1247_v62 }
 0x6fb   :  { %v1293_v2 = vadd.f32 %v1292_v37, %v1291_v35  ;;  %v1251_v3 = vmul.f32 0.0625, %v1249_v1 }
 0x6fd   :  { %v1294_v26 = vmul.f32 0.0625, %v1293_v2  ;;  %v1252_v4 = vsub.f32 %v2455_v17, %v1251_v3  ;;  %v1253_v59 = vsub.f32 %v2460_v51, %v1251_v3 }
 0x6ff   :  { %1296 = vrot.lane.b32.xlu0 %v1294_v26, %s1984_s0  ;;  %v1254_v16 = vmul.f32 %v1252_v4, %v1252_v4  ;;  %v1255_v9 = vmul.f32 %v1253_v59, %v1253_v59 }
 0x701   :  { %v1256_v38 = vsel %vm1240_vm0, %v1254_v16, 0.0  ;;  %v1257_v15 = vsel %vm1240_vm0, %v1255_v9, 0.0 }
 0x702   :  { %v1258_v40 = vadd.f32 %v1257_v15, %v1256_v38 }
 0x703   :  { %1377 = vrot.lane.b32.xlu0 %v50_v5, %s1984_s0 }
 0x704   :  { %v1259_v6 = vrot.slane %v1258_v40, 4 }
 0x706   :  { %v1260_v7 = vadd.f32 %v1259_v6, %v1258_v40 }
 0x708   :  { %v1261_v41 = vrot.slane %v1260_v7, 2 }
 0x70a   :  { %v1262_v43 = vadd.f32 %v1261_v41, %v1260_v7 }
 0x70c   :  { %v1263_v14 = vrot.slane %v1262_v43, 1 }
 0x70e   :  { %v1264_v39 = vadd.f32 %v1263_v14, %v1262_v43 }
 0x710   :  { %v1265_v33 = vmul.f32 0.0625, %v1264_v39 }
 0x712   :  { %v1266_v13 = vadd.f32 1e-05, %v1265_v33 }
 0x714   :  { %1909 = vrsqrt.f32 %v1266_v13 }
 0x71e   :  { %v1910_v45 = vpop.eup %1909 }
 0x71f   :  { %v1268_v42 = vmul.f32 %v1910_v45, %v1252_v4  ;;  %v1269_v44 = vmul.f32 %v1910_v45, %v1253_v59 }
 0x721   :  { %v1274_v52 = vmul.f32 %v1273_v22, %v1268_v42  ;;  %v1275_v47 = vmul.f32 %v1273_v22, %v1269_v44 }
 0x723   :  { %v1280_v29 = vadd.f32 %v1590_v20, %v1274_v52  ;;  %v1281_v19 = vadd.f32 %v1590_v20, %v1275_v47 }
 0x725   :  { %v1381_v27 = vmax.f32 %v1280_v29, 0.0  ;;  %v1382_v48 = vmax.f32 %v1281_v19, 0.0  ;;  %v1385_v23 = vsub.f32 0.0, %v1280_v29  ;;  %v1386_v53 = vsub.f32 0.0, %v1281_v19 }
 0x727   :  { %v1383_v54 = vmul.f32 1.4142135, %v1381_v27  ;;  %v1384_v30 = vmul.f32 1.4142135, %v1382_v48  ;;  %v1387_v24 = vmul.f32 1.442695, %v1385_v23 }
 0x728   :  { %v1389_v55 = vmul.f32 1.442695, %v1386_v53 }
 0x729   :  { %1506 = vst.msk [vmem:[#allocation5] sm:$0xff] %vm1413_vm6, %v1383_v54  ;;  %1507 = vst.msk [vmem:[#allocation5 + $0x8] sm:$0xff] %vm1413_vm6, %v1384_v30 }
 0x771   :  { %v1297_v25 = vpop.permute.xlu0 %1296 }
 0x772   :  { %1772 = vmatmul.mubr.msk.f32.vlgmr.msra.gmra.mrb[18].mxu1 %vm1298_vm7, %v1297_v25 }
 0x773   :  { %1775 = vmatpush3.msk.msra.mxu1 %vm1301_vm12, %v49_v49 }
 0x775   :  { %v1378_v12 = vpop.permute.xlu0 %1377 }
 0x845   :  { %v1371_v50 = vpop.f32.mrb[18].mxu1 }
 0x846   :  { %v1372_v11 = vadd.f32 1e-05, %v1371_v50  ;;  %v1773_v46 = vpop.f32.mrb[19].mxu1 }
 0x848   :  { %1911 = vrsqrt.f32 %v1372_v11 }
 0x849   :  { %1913 = vpow2.f32 %v1387_v24 }
 0x84a   :  { %1915 = vpow2.f32 %v1389_v55 }
 0x852   :  { %v1912_v18 = vpop.eup %1911 }
 0x853   :  { %v1380_v8 = vmul.f32 %v1912_v18, %v1378_v12  ;;  %v1914_v10 = vpop.eup %1913 }
 0x854   :  { %v1391_v57 = vadd.f32 1.0, %v1914_v10  ;;  %v1916_v32 = vpop.eup %1915 }
 0x855   :  { %v1400_v28 = vrot.slane %v1380_v8, %v1272_v31  ;;  %v1392_v58 = vadd.f32 1.0, %v1916_v32 }
 0x856   :  { %1917 = vrcp.f32 %v1391_v57 }
 0x857   :  { %1402 = vrot.lane.b32.xlu0 %v1400_v28, %s1985_s14  ;;  %1919 = vrcp.f32 %v1392_v58 }
 0x860   :  { %v1918_v34 = vpop.eup %1917 }
 0x861   :  { %v1394_v60 = vmul.f32 1.8462286, %v1918_v34  ;;  %v1920_v63 = vpop.eup %1919 }
 0x862   :  { %v1396_v56 = vmul.f32 1.8462286, %v1920_v63 }
 0x8c9   :  { %v1403_v61 = vpop.permute.xlu0 %1402 }
 0x8ca   :  { %v1405_v0 = vmul.f32 %v1403_v61, %v1394_v60  ;;  %v1406_v62 = vmul.f32 %v1403_v61, %v1396_v56 }
 0x8cc   :  { %1409 = vrot.lane.b32.xlu0 %v1405_v0, %s1986_s15 }
 0x8d0   :  { %1411 = vrot.lane.b32.xlu0 %v1406_v62, %s1986_s15 }
 0x93e   :  { %v1410_v35 = vpop.permute.xlu0 %1409 }
 0x93f   :  { %1776 = vmatprep.mubr.msk.f32.mxu1 %vm1413_vm6, %v1410_v35 }
 0x942   :  { %v1412_v36 = vpop.permute.xlu0 %1411 }
 0x943   :  { %1777 = vmatmul.mubr.msk.f32.vlgmr.msra.gmra.mrb[20].mxu1 %vm1413_vm6, %v1412_v36 }
 0xa16   :  { %v1778_v37 = vpop.f32.mrb[20].mxu1 }
 0xa17   :  { %v1487_v1 = vpop.f32.mrb[21].mxu1 }
 0xa18   :  { %1498 = vrot.lane.b32.xlu0 %v1487_v1, %s1973_s23 }
 0xa1c   :  { %1500 = vrot.lane.b32.xlu0 %v1778_v37, %s1973_s23 }
 0xa8a   :  { %v1499_v2 = vpop.permute.xlu0 %1498 }
 0xa8b   :  { %v1504_v3 = vmul.f32 %v1499_v2, %v2455_v17 }
 0xa8d   :  { %1510 = vrot.lane.b32.xlu0 %v1504_v3, %s1986_s15 }
 0xa8e   :  { %v1501_v26 = vpop.permute.xlu0 %1500 }
 0xa8f   :  { %v1505_v4 = vmul.f32 %v1501_v26, %v2460_v51 }
 0xa91   :  { %1512 = vrot.lane.b32.xlu0 %v1505_v4, %s1986_s15 }
 0xaff   :  { %v1511_v59 = vpop.permute.xlu0 %1510 }
 0xb00   :  { %1517 = vst.msk [vmem:[#allocation5] sm:$0xff] %vm1516_vm8, %v1511_v59 }
 0xb03   :  { %v1513_v16 = vpop.permute.xlu0 %1512 }
 0xb04   :  { %1518 = vst.msk [vmem:[#allocation5 + $0x8] sm:$0xff] %vm1516_vm8, %v1513_v16 }
 0xb05   :  { %1956 = shalt.err (!%p1953_p12)
}
 0xb06   :  { %s1957_s21 = scalar_lea.hbm %s2503_s3, 256 }
 0xb07   :  { %p1958_p13 = scmp.ne.s32.totalorder %s2503_s3, %s1957_s21  ;;  %p1961_p0 = scmp.lt.u32.totalorder %s1957_s21, %s2503_s3 }
 0xb09   :  { %p1963_p1 = pnand %p1961_p0, %p1958_p13 }
 0xb0b   :  { %1966 = shalt.err (!%p1963_p1)
}
 0xb0c   :  { %1530 = dma.vmem_to_hbm [thread:$0]  %s1525_s17, 256, %s2503_s3, [#allocation4], %s1972_s22, %s1972_s22, %s1973_s23  }
 0xb0d   :  { %1969 = dma.done.wait [#allocation4], 256  }
 0xb0e   :  { %1970 = vsyncadd [#allocation4], 4294967040 }
 0xb0f   :  { %1534 = vsyncpa [#allocation3], 1 }
 0xb10   :  { %1535 = vsyncpa [#allocation4], 1 }

</bundles_post_ra>
